<compile_context>
chip_gen: v7x
topology: tpu7x:2x2x1
jax: 0.10.0
libtpu: 0.0.40
codegen_flags: <defaults>
</compile_context>

<pallas_src>
import functools

import jax
import jax.numpy as jnp
from jax.experimental import pallas as pl
from jax.experimental.pallas import tpu as pltpu

_TILE = 256                    # node tile (dst and src) for the large-graph path
_FUSED_MAX_NODES_PAD = 1024    # fully-fused single-kernel path threshold


def _round_up(x, m):
    return ((x + m - 1) // m) * m


def _pad_layer_weights(w1, b1, w2, b2, hidden, h_pad):
    """Pad one GIN MLP (torch layout: W is [out, in]) to lane-dense bf16/f32 operands."""
    c_in = w1.shape[1]
    c_in_p = _round_up(c_in, 128)
    w1p = jnp.zeros((c_in_p, h_pad), jnp.bfloat16).at[:c_in, :hidden].set(
        w1.T.astype(jnp.bfloat16))
    b1p = jnp.zeros((1, h_pad), jnp.float32).at[0, :hidden].set(b1)
    w2p = jnp.zeros((h_pad, h_pad), jnp.bfloat16).at[:hidden, :hidden].set(
        w2.T.astype(jnp.bfloat16))
    b2p = jnp.zeros((1, h_pad), jnp.float32).at[0, :hidden].set(b2)
    return w1p, b1p, w2p, b2p


# --------------------------------------------------------------------------------------
# Fused small-graph kernel: all GIN layers + global_max_pool + fc in one pallas_call.
# --------------------------------------------------------------------------------------
def _fused_small_kernel(*refs, num_layers, num_graphs):
    adj_ref, x_ref, batch_ref = refs[0], refs[1], refs[2]
    layer_refs = refs[3:3 + 4 * num_layers]
    wfc_ref = refs[3 + 4 * num_layers]
    bfc_ref = refs[4 + 4 * num_layers]
    out_ref = refs[5 + 4 * num_layers]
    pooled_ref = refs[6 + 4 * num_layers]

    adj = adj_ref[...]                                     # bf16 [N, N]  (I + A)
    h = x_ref[...]                                         # bf16 [N, C]
    for layer in range(num_layers):
        w1, b1, w2, b2 = layer_refs[4 * layer:4 * layer + 4]
        agg = jnp.dot(adj, h, preferred_element_type=jnp.float32)
        z = jnp.dot(agg.astype(jnp.bfloat16), w1[...],
                    preferred_element_type=jnp.float32) + b1[...]
        z = jnp.maximum(z, 0.0)
        z = jnp.dot(z.astype(jnp.bfloat16), w2[...],
                    preferred_element_type=jnp.float32) + b2[...]
        if layer < num_layers - 1:
            z = jnp.maximum(z, 0.0)                        # BasicGNN inter-layer ReLU
        h = z.astype(jnp.bfloat16)

    # global_max_pool: in-kernel int compare against the batch column (no [N,G] bias array)
    hf = h.astype(jnp.float32)
    bcol = batch_ref[...]                                  # int32 [N, 1]; padded rows = -1
    for g in range(num_graphs):                            # small static loop
        masked = jnp.where(bcol == g, hf, -jnp.inf)
        pooled_ref[g:g + 1, :] = jnp.max(masked, axis=0, keepdims=True)

    pooled = pooled_ref[...].astype(jnp.bfloat16)          # [G, H]
    out_ref[...] = (jnp.dot(pooled, wfc_ref[...], preferred_element_type=jnp.float32)
                    + bfc_ref[...])


def _fused_forward(adj, x, batch_col, padded_layers, wfc_p, bfc_p, num_graphs):
    num_layers = len(padded_layers)
    h_pad, cls_pad = wfc_p.shape
    vmem = pl.BlockSpec(memory_space=pltpu.MemorySpace.VMEM)

    args = [adj, x, batch_col]
    for lp in padded_layers:
        args.extend(lp)
    args.extend([wfc_p, bfc_p])

    total_bytes = sum(int(a.size) * a.dtype.itemsize for a in args)
    vmem_limit = int(min(max(4 * total_bytes, 16 * 2**20), 48 * 2**20))

    return pl.pallas_call(
        functools.partial(_fused_small_kernel, num_layers=num_layers,
                          num_graphs=num_graphs),
        out_shape=jax.ShapeDtypeStruct((num_graphs, cls_pad), jnp.float32),
        in_specs=[vmem] * len(args),
        out_specs=vmem,
        scratch_shapes=[pltpu.VMEM((num_graphs, h_pad), jnp.float32)],
        compiler_params=pltpu.CompilerParams(vmem_limit_bytes=vmem_limit),
    )(*args)


# --------------------------------------------------------------------------------------
# Large-graph per-layer GINConv kernel:  out = MLP((I + A) @ x)   (eps = 0)
# --------------------------------------------------------------------------------------
def _gin_layer_kernel(a_ref, x_ref, w1_ref, b1_ref, w2_ref, b2_ref, out_ref, acc_ref,
                      *, last_layer, tile_k, resident_x):
    k = pl.program_id(1)

    @pl.when(k == 0)
    def _():
        acc_ref[...] = jnp.zeros_like(acc_ref)

    if resident_x:
        off = pl.multiple_of(k * tile_k, tile_k)
        xs = x_ref[pl.ds(off, tile_k), :]                  # slice the VMEM-resident x
    else:
        xs = x_ref[...]

    # (I + A)_tile @ x_tile : bf16 MXU operands, f32 accumulation.
    acc_ref[...] += jnp.dot(a_ref[...], xs, preferred_element_type=jnp.float32)

    @pl.when(k == pl.num_programs(1) - 1)
    def _():
        h = acc_ref[...].astype(jnp.bfloat16)
        z = jnp.dot(h, w1_ref[...], preferred_element_type=jnp.float32) + b1_ref[...]
        z = jnp.maximum(z, 0.0).astype(jnp.bfloat16)
        z = jnp.dot(z, w2_ref[...], preferred_element_type=jnp.float32) + b2_ref[...]
        if not last_layer:
            z = jnp.maximum(z, 0.0)
        out_ref[...] = z.astype(out_ref.dtype)


def _gin_layer(adj, h, w1, b1, w2, b2, *, tile_n, tile_k, last_layer):
    n_pad = adj.shape[0]
    c_pad = h.shape[1]
    h_out = w1.shape[1]
    grid = (n_pad // tile_n, n_pad // tile_k)

    # VMEM budget (double-buffered streaming blocks + resident weights + f32 accumulator),
    # kept safely under v7x's 64 MiB physical VMEM.
    weight_bytes = c_pad * h_out * 2 + h_out * 4 + h_out * h_out * 2 + h_out * 4
    base_bytes = (2 * tile_n * tile_k * 2        # adjacency blocks (double-buffered)
                  + 2 * weight_bytes             # weights/biases (resident, 2 bufs by default)
                  + 2 * tile_n * h_out * 2       # output block
                  + tile_n * c_pad * 4)          # f32 accumulator scratch
    x_resident_bytes = 2 * n_pad * c_pad * 2
    resident_x = (base_bytes + x_resident_bytes) <= 36 * 2**20
    x_bytes = x_resident_bytes if resident_x else 2 * tile_k * c_pad * 2
    vmem_limit = int(min(max(2 * (base_bytes + x_bytes), 16 * 2**20), 48 * 2**20))

    if resident_x:
        x_spec = pl.BlockSpec((n_pad, c_pad), lambda i, k: (0, 0))   # whole x stays in VMEM
    else:
        x_spec = pl.BlockSpec((tile_k, c_pad), lambda i, k: (k, 0))  # stream src tiles

    return pl.pallas_call(
        functools.partial(_gin_layer_kernel, last_layer=last_layer, tile_k=tile_k,
                          resident_x=resident_x),
        out_shape=jax.ShapeDtypeStruct((n_pad, h_out), jnp.bfloat16),
        grid_spec=pltpu.PrefetchScalarGridSpec(
            num_scalar_prefetch=0,
            grid=grid,
            in_specs=[
                pl.BlockSpec((tile_n, tile_k), lambda i, k: (i, k)),   # (I+A) tile stream
                x_spec,                                                # x (resident or stream)
                pl.BlockSpec((c_pad, h_out), lambda i, k: (0, 0)),     # W1 (resident)
                pl.BlockSpec((1, h_out), lambda i, k: (0, 0)),         # b1 (resident)
                pl.BlockSpec((h_out, h_out), lambda i, k: (0, 0)),     # W2 (resident)
                pl.BlockSpec((1, h_out), lambda i, k: (0, 0)),         # b2 (resident)
            ],
            out_specs=pl.BlockSpec((tile_n, h_out), lambda i, k: (i, 0)),
            scratch_shapes=[pltpu.VMEM((tile_n, c_pad), jnp.float32)],
        ),
        compiler_params=pltpu.CompilerParams(
            dimension_semantics=("parallel", "arbitrary"),   # dst tiles shard across TCs
            vmem_limit_bytes=vmem_limit,
        ),
    )(adj, h, w1, b1, w2, b2)


# --------------------------------------------------------------------------------------
# Tiled global_max_pool (running per-graph max) + final Linear
# --------------------------------------------------------------------------------------
def _pool_fc_kernel(h_ref, batch_ref, wfc_ref, bfc_ref, out_ref, pooled_ref, *, num_graphs):
    i = pl.program_id(0)

    @pl.when(i == 0)
    def _():
        pooled_ref[...] = jnp.full(pooled_ref.shape, -jnp.inf, jnp.float32)

    hf = h_ref[...].astype(jnp.float32)                    # [tile_n, H]
    bcol = batch_ref[...]                                  # int32 [tile_n, 1]
    for g in range(num_graphs):                            # small static loop (VPU compare)
        masked = jnp.where(bcol == g, hf, -jnp.inf)
        pooled_ref[g:g + 1, :] = jnp.maximum(pooled_ref[g:g + 1, :],
                                             jnp.max(masked, axis=0, keepdims=True))

    @pl.when(i == pl.num_programs(0) - 1)
    def _():
        pooled = pooled_ref[...].astype(jnp.bfloat16)      # [G, H]
        out_ref[...] = (jnp.dot(pooled, wfc_ref[...], preferred_element_type=jnp.float32)
                        + bfc_ref[...])


def _pool_fc(h, batch_col, wfc, bfc, num_graphs, *, tile_n):
    n_pad, h_pad = h.shape
    cls_pad = wfc.shape[1]
    grid = (n_pad // tile_n,)

    blk_bytes = (2 * tile_n * h_pad * 2 + 2 * tile_n * 128 * 4
                 + 2 * (h_pad * cls_pad * 2 + cls_pad * 4)
                 + num_graphs * (h_pad + cls_pad) * 4)
    vmem_limit = int(min(max(4 * blk_bytes, 16 * 2**20), 48 * 2**20))

    return pl.pallas_call(
        functools.partial(_pool_fc_kernel, num_graphs=num_graphs),
        out_shape=jax.ShapeDtypeStruct((num_graphs, cls_pad), jnp.float32),
        grid_spec=pltpu.PrefetchScalarGridSpec(
            num_scalar_prefetch=0,
            grid=grid,
            in_specs=[
                pl.BlockSpec((tile_n, h_pad), lambda i: (i, 0)),     # h node tile
                pl.BlockSpec((tile_n, 1), lambda i: (i, 0)),         # batch column tile
                pl.BlockSpec((h_pad, cls_pad), lambda i: (0, 0)),    # fc weight (resident)
                pl.BlockSpec((1, cls_pad), lambda i: (0, 0)),        # fc bias (resident)
            ],
            out_specs=pl.BlockSpec((num_graphs, cls_pad), lambda i: (0, 0)),
            scratch_shapes=[pltpu.VMEM((num_graphs, h_pad), jnp.float32)],
        ),
        compiler_params=pltpu.CompilerParams(
            dimension_semantics=("arbitrary",),
            vmem_limit_bytes=vmem_limit,
        ),
    )(h, batch_col, wfc, bfc)


# --------------------------------------------------------------------------------------
# Wrapper: GINNetwork.forward with graph_level_task=True
# --------------------------------------------------------------------------------------
def gin_network_forward(x, edge_index, batch, layer_params, fc_params, num_graphs):
    n_nodes, in_channels = x.shape
    hidden = layer_params[0][0].shape[0]          # torch Linear weight is [out, in]
    wfc, bfc = fc_params
    num_classes = wfc.shape[0]
    num_layers = len(layer_params)

    h_pad = _round_up(hidden, 128)
    cls_pad = _round_up(num_classes, 128)
    c_in_pad = _round_up(in_channels, 128)

    n_pad_small = _round_up(n_nodes, 128)
    fused = n_pad_small <= _FUSED_MAX_NODES_PAD
    n_pad = n_pad_small if fused else _round_up(n_nodes, _TILE)

    # Dense (I + A) adjacency (GIN eps=0 self-term folded into the diagonal), bf16 operand.
    # Note: bf16 represents edge multiplicities exactly only up to 256 parallel edges/pair.
    adj = jnp.zeros((n_pad, n_pad), jnp.float32)
    adj = adj.at[edge_index[1], edge_index[0]].add(1.0)
    diag = jnp.arange(n_nodes)
    adj = adj.at[diag, diag].add(1.0)
    adj = adj.astype(jnp.bfloat16)

    # Node features zero-padded to lane-dense width, bf16.
    h0 = jnp.zeros((n_pad, c_in_pad), jnp.bfloat16)
    h0 = h0.at[:n_nodes, :in_channels].set(x.astype(jnp.bfloat16))

    # int32 batch column; padded nodes get -1 so they never match any graph id.
    batch_col = jnp.full((n_pad, 1), -1, jnp.int32)
    batch_col = batch_col.at[:n_nodes, 0].set(batch.astype(jnp.int32))

    padded_layers = [_pad_layer_weights(w1, b1, w2, b2, hidden, h_pad)
                     for (w1, b1, w2, b2) in layer_params]
    wfc_p = jnp.zeros((h_pad, cls_pad), jnp.bfloat16).at[:hidden, :num_classes].set(
        wfc.T.astype(jnp.bfloat16))
    bfc_p = jnp.zeros((1, cls_pad), jnp.float32).at[0, :num_classes].set(bfc)

    if fused:
        out = _fused_forward(adj, h0, batch_col, padded_layers, wfc_p, bfc_p, num_graphs)
    else:
        h = h0
        for layer, lp in enumerate(padded_layers):
            h = _gin_layer(adj, h, *lp, tile_n=_TILE, tile_k=_TILE,
                           last_layer=(layer == num_layers - 1))
        out = _pool_fc(h, batch_col, wfc_p, bfc_p, num_graphs, tile_n=_TILE)

    return out[:, :num_classes]


# --------------------------------------------------------------------------------------
# Pure-JAX reference mirroring the kernel's bf16-operand / f32-accumulation precision.
# --------------------------------------------------------------------------------------
def _reference(x, edge_index, batch, layer_params, fc_params, num_graphs):
    n = x.shape[0]
    adj = jnp.zeros((n, n), jnp.float32).at[edge_index[1], edge_index[0]].add(1.0)
    adj = (adj + jnp.eye(n, dtype=jnp.float32)).astype(jnp.bfloat16)
    h = x.astype(jnp.bfloat16)
    num_layers = len(layer_params)
    for layer, (w1, b1, w2, b2) in enumerate(layer_params):
        agg = jnp.dot(adj, h, preferred_element_type=jnp.float32)
        z = jnp.dot(agg.astype(jnp.bfloat16), w1.T.astype(jnp.bfloat16),
                    preferred_element_type=jnp.float32) + b1
        z = jnp.maximum(z, 0.0)
        z = jnp.dot(z.astype(jnp.bfloat16), w2.T.astype(jnp.bfloat16),
                    preferred_element_type=jnp.float32) + b2
        if layer < num_layers - 1:
            z = jnp.maximum(z, 0.0)
        h = z.astype(jnp.bfloat16)
    hf = h.astype(jnp.float32)
    pooled = []
    for g in range(num_graphs):
        mask = (batch == g)[:, None]
        pooled.append(jnp.max(jnp.where(mask, hf, -jnp.inf), axis=0))
    pooled = jnp.stack(pooled, axis=0)
    wfc, bfc = fc_params
    return jnp.dot(pooled.astype(jnp.bfloat16), wfc.T.astype(jnp.bfloat16),
                   preferred_element_type=jnp.float32) + bfc


if __name__ == "__main__":
    def lin_init(k, fan_out, fan_in):
        kw, kb = jax.random.split(k)
        scale = 1.0 / jnp.sqrt(jnp.float32(fan_in))
        w = jax.random.uniform(kw, (fan_out, fan_in), jnp.float32, -scale, scale)
        b = jax.random.uniform(kb, (fan_out,), jnp.float32, -scale, scale)
        return w, b

    def make_params(key, in_channels, hidden, num_layers, num_classes):
        keys = jax.random.split(key, num_layers * 2 + 1)
        layer_params = []
        for layer in range(num_layers):
            c_in = in_channels if layer == 0 else hidden
            w1, b1 = lin_init(keys[2 * layer], hidden, c_in)
            w2, b2 = lin_init(keys[2 * layer + 1], hidden, hidden)
            layer_params.append((w1, b1, w2, b2))
        fc_params = lin_init(keys[-1], num_classes, hidden)
        return layer_params, fc_params

    def make_graph(key, nodes_per_graph, num_graphs, edges_per_graph, in_channels):
        n = nodes_per_graph * num_graphs
        kx, ke = jax.random.split(key)
        x = jax.random.normal(kx, (n, in_channels), jnp.float32)
        batch = jnp.repeat(jnp.arange(num_graphs, dtype=jnp.int32), nodes_per_graph)
        ekeys = jax.random.split(ke, 2 * num_graphs)
        srcs, dsts = [], []
        for g in range(num_graphs):
            lo, hi = g * nodes_per_graph, (g + 1) * nodes_per_graph
            srcs.append(jax.random.randint(ekeys[2 * g], (edges_per_graph,), lo, hi))
            dsts.append(jax.random.randint(ekeys[2 * g + 1], (edges_per_graph,), lo, hi))
        edge_index = jnp.stack([jnp.concatenate(srcs),
                                jnp.concatenate(dsts)]).astype(jnp.int32)
        return x, edge_index, batch

    key = jax.random.PRNGKey(0)
    k1, k2, k3, k4 = jax.random.split(key, 4)

    # ---- Test 1: small graphs -> fully fused single-kernel path ----
    in_c, hid, n_layers, n_cls, n_graphs = 16, 32, 3, 8, 2
    x1, ei1, b1_ = make_graph(k1, 8, n_graphs, 16, in_c)
    lp1, fp1 = make_params(k2, in_c, hid, n_layers, n_cls)
    out1 = jax.block_until_ready(gin_network_forward(x1, ei1, b1_, lp1, fp1, n_graphs))
    ref1 = _reference(x1, ei1, b1_, lp1, fp1, n_graphs)
    assert out1.shape == (n_graphs, n_cls)
    assert jnp.allclose(out1, ref1, rtol=2e-2, atol=2e-2), (out1, ref1)

    # ---- Test 2: larger graph -> tiled (256-wide, resident-x) layers + tiled pool/fc ----
    in_c2, hid2, n_layers2, n_cls2, n_graphs2 = 16, 32, 2, 5, 3
    x2, ei2, b2_ = make_graph(k3, 500, n_graphs2, 1500, in_c2)
    lp2, fp2 = make_params(k4, in_c2, hid2, n_layers2, n_cls2)
    out2 = jax.block_until_ready(gin_network_forward(x2, ei2, b2_, lp2, fp2, n_graphs2))
    ref2 = _reference(x2, ei2, b2_, lp2, fp2, n_graphs2)
    assert out2.shape == (n_graphs2, n_cls2)
    assert jnp.allclose(out2, ref2, rtol=2e-2, atol=2e-2), (out2, ref2)

    print("KERNEL_OK")
</pallas_src>

<mosaic_0001>
module attributes {stable_mosaic.version = 11 : i64} {
  func.func @_fused_small_kernel(%arg0: memref<128x128xbf16, #tpu.memory_space<vmem>>, %arg1: memref<128x128xbf16, #tpu.memory_space<vmem>>, %arg2: memref<128x1xi32, #tpu.memory_space<vmem>>, %arg3: memref<128x128xbf16, #tpu.memory_space<vmem>>, %arg4: memref<1x128xf32, #tpu.memory_space<vmem>>, %arg5: memref<128x128xbf16, #tpu.memory_space<vmem>>, %arg6: memref<1x128xf32, #tpu.memory_space<vmem>>, %arg7: memref<128x128xbf16, #tpu.memory_space<vmem>>, %arg8: memref<1x128xf32, #tpu.memory_space<vmem>>, %arg9: memref<128x128xbf16, #tpu.memory_space<vmem>>, %arg10: memref<1x128xf32, #tpu.memory_space<vmem>>, %arg11: memref<128x128xbf16, #tpu.memory_space<vmem>>, %arg12: memref<1x128xf32, #tpu.memory_space<vmem>>, %arg13: memref<128x128xbf16, #tpu.memory_space<vmem>>, %arg14: memref<1x128xf32, #tpu.memory_space<vmem>>, %arg15: memref<128x128xbf16, #tpu.memory_space<vmem>>, %arg16: memref<1x128xf32, #tpu.memory_space<vmem>>, %arg17: memref<2x128xf32, #tpu.memory_space<vmem>>, %arg18: memref<2x128xf32, #tpu.memory_space<vmem>>) attributes {dimension_semantics = [], scalar_prefetch = 0 : i64, scratch_operands = 1 : i64, tpu.core_type = #tpu.core_type<tc>} {
    %c0 = arith.constant 0 : index
    %c0_0 = arith.constant 0 : index
    %0 = vector.load %arg0[%c0, %c0_0] : memref<128x128xbf16, #tpu.memory_space<vmem>>, vector<128x128xbf16>
    %c0_1 = arith.constant 0 : index
    %c0_2 = arith.constant 0 : index
    %1 = vector.load %arg1[%c0_1, %c0_2] : memref<128x128xbf16, #tpu.memory_space<vmem>>, vector<128x128xbf16>
    %cst = arith.constant dense<0.000000e+00> : vector<128x128xf32>
    %2 = tpu.matmul %0, %1, %cst {dimension_numbers = #tpu.dot_dimension_numbers<[1], [0], [0], [1], [0, 0, 1, 1], [], []>} : vector<128x128xbf16>, vector<128x128xbf16>, vector<128x128xf32> -> vector<128x128xf32>
    %3 = arith.truncf %2 : vector<128x128xf32> to vector<128x128xbf16>
    %c0_3 = arith.constant 0 : index
    %c0_4 = arith.constant 0 : index
    %4 = vector.load %arg3[%c0_3, %c0_4] : memref<128x128xbf16, #tpu.memory_space<vmem>>, vector<128x128xbf16>
    %cst_5 = arith.constant dense<0.000000e+00> : vector<128x128xf32>
    %5 = tpu.matmul %3, %4, %cst_5 {dimension_numbers = #tpu.dot_dimension_numbers<[1], [0], [0], [1], [0, 0, 1, 1], [], []>} : vector<128x128xbf16>, vector<128x128xbf16>, vector<128x128xf32> -> vector<128x128xf32>
    %c0_6 = arith.constant 0 : index
    %c0_7 = arith.constant 0 : index
    %6 = vector.load %arg4[%c0_6, %c0_7] : memref<1x128xf32, #tpu.memory_space<vmem>>, vector<1x128xf32>
    %7 = vector.broadcast %6 : vector<1x128xf32> to vector<128x128xf32>
    %8 = arith.addf %5, %7 : vector<128x128xf32>
    %cst_8 = arith.constant 0.000000e+00 : f32
    %9 = vector.broadcast %cst_8 : f32 to vector<128x128xf32>
    %10 = arith.maximumf %8, %9 : vector<128x128xf32>
    %11 = arith.truncf %10 : vector<128x128xf32> to vector<128x128xbf16>
    %c0_9 = arith.constant 0 : index
    %c0_10 = arith.constant 0 : index
    %12 = vector.load %arg5[%c0_9, %c0_10] : memref<128x128xbf16, #tpu.memory_space<vmem>>, vector<128x128xbf16>
    %cst_11 = arith.constant dense<0.000000e+00> : vector<128x128xf32>
    %13 = tpu.matmul %11, %12, %cst_11 {dimension_numbers = #tpu.dot_dimension_numbers<[1], [0], [0], [1], [0, 0, 1, 1], [], []>} : vector<128x128xbf16>, vector<128x128xbf16>, vector<128x128xf32> -> vector<128x128xf32>
    %c0_12 = arith.constant 0 : index
    %c0_13 = arith.constant 0 : index
    %14 = vector.load %arg6[%c0_12, %c0_13] : memref<1x128xf32, #tpu.memory_space<vmem>>, vector<1x128xf32>
    %15 = vector.broadcast %14 : vector<1x128xf32> to vector<128x128xf32>
    %16 = arith.addf %13, %15 : vector<128x128xf32>
    %cst_14 = arith.constant 0.000000e+00 : f32
    %17 = vector.broadcast %cst_14 : f32 to vector<128x128xf32>
    %18 = arith.maximumf %16, %17 : vector<128x128xf32>
    %19 = arith.truncf %18 : vector<128x128xf32> to vector<128x128xbf16>
    %cst_15 = arith.constant dense<0.000000e+00> : vector<128x128xf32>
    %20 = tpu.matmul %0, %19, %cst_15 {dimension_numbers = #tpu.dot_dimension_numbers<[1], [0], [0], [1], [0, 0, 1, 1], [], []>} : vector<128x128xbf16>, vector<128x128xbf16>, vector<128x128xf32> -> vector<128x128xf32>
    %21 = arith.truncf %20 : vector<128x128xf32> to vector<128x128xbf16>
    %c0_16 = arith.constant 0 : index
    %c0_17 = arith.constant 0 : index
    %22 = vector.load %arg7[%c0_16, %c0_17] : memref<128x128xbf16, #tpu.memory_space<vmem>>, vector<128x128xbf16>
    %cst_18 = arith.constant dense<0.000000e+00> : vector<128x128xf32>
    %23 = tpu.matmul %21, %22, %cst_18 {dimension_numbers = #tpu.dot_dimension_numbers<[1], [0], [0], [1], [0, 0, 1, 1], [], []>} : vector<128x128xbf16>, vector<128x128xbf16>, vector<128x128xf32> -> vector<128x128xf32>
    %c0_19 = arith.constant 0 : index
    %c0_20 = arith.constant 0 : index
    %24 = vector.load %arg8[%c0_19, %c0_20] : memref<1x128xf32, #tpu.memory_space<vmem>>, vector<1x128xf32>
    %25 = vector.broadcast %24 : vector<1x128xf32> to vector<128x128xf32>
    %26 = arith.addf %23, %25 : vector<128x128xf32>
    %cst_21 = arith.constant 0.000000e+00 : f32
    %27 = vector.broadcast %cst_21 : f32 to vector<128x128xf32>
    %28 = arith.maximumf %26, %27 : vector<128x128xf32>
    %29 = arith.truncf %28 : vector<128x128xf32> to vector<128x128xbf16>
    %c0_22 = arith.constant 0 : index
    %c0_23 = arith.constant 0 : index
    %30 = vector.load %arg9[%c0_22, %c0_23] : memref<128x128xbf16, #tpu.memory_space<vmem>>, vector<128x128xbf16>
    %cst_24 = arith.constant dense<0.000000e+00> : vector<128x128xf32>
    %31 = tpu.matmul %29, %30, %cst_24 {dimension_numbers = #tpu.dot_dimension_numbers<[1], [0], [0], [1], [0, 0, 1, 1], [], []>} : vector<128x128xbf16>, vector<128x128xbf16>, vector<128x128xf32> -> vector<128x128xf32>
    %c0_25 = arith.constant 0 : index
    %c0_26 = arith.constant 0 : index
    %32 = vector.load %arg10[%c0_25, %c0_26] : memref<1x128xf32, #tpu.memory_space<vmem>>, vector<1x128xf32>
    %33 = vector.broadcast %32 : vector<1x128xf32> to vector<128x128xf32>
    %34 = arith.addf %31, %33 : vector<128x128xf32>
    %cst_27 = arith.constant 0.000000e+00 : f32
    %35 = vector.broadcast %cst_27 : f32 to vector<128x128xf32>
    %36 = arith.maximumf %34, %35 : vector<128x128xf32>
    %37 = arith.truncf %36 : vector<128x128xf32> to vector<128x128xbf16>
    %cst_28 = arith.constant dense<0.000000e+00> : vector<128x128xf32>
    %38 = tpu.matmul %0, %37, %cst_28 {dimension_numbers = #tpu.dot_dimension_numbers<[1], [0], [0], [1], [0, 0, 1, 1], [], []>} : vector<128x128xbf16>, vector<128x128xbf16>, vector<128x128xf32> -> vector<128x128xf32>
    %39 = arith.truncf %38 : vector<128x128xf32> to vector<128x128xbf16>
    %c0_29 = arith.constant 0 : index
    %c0_30 = arith.constant 0 : index
    %40 = vector.load %arg11[%c0_29, %c0_30] : memref<128x128xbf16, #tpu.memory_space<vmem>>, vector<128x128xbf16>
    %cst_31 = arith.constant dense<0.000000e+00> : vector<128x128xf32>
    %41 = tpu.matmul %39, %40, %cst_31 {dimension_numbers = #tpu.dot_dimension_numbers<[1], [0], [0], [1], [0, 0, 1, 1], [], []>} : vector<128x128xbf16>, vector<128x128xbf16>, vector<128x128xf32> -> vector<128x128xf32>
    %c0_32 = arith.constant 0 : index
    %c0_33 = arith.constant 0 : index
    %42 = vector.load %arg12[%c0_32, %c0_33] : memref<1x128xf32, #tpu.memory_space<vmem>>, vector<1x128xf32>
    %43 = vector.broadcast %42 : vector<1x128xf32> to vector<128x128xf32>
    %44 = arith.addf %41, %43 : vector<128x128xf32>
    %cst_34 = arith.constant 0.000000e+00 : f32
    %45 = vector.broadcast %cst_34 : f32 to vector<128x128xf32>
    %46 = arith.maximumf %44, %45 : vector<128x128xf32>
    %47 = arith.truncf %46 : vector<128x128xf32> to vector<128x128xbf16>
    %c0_35 = arith.constant 0 : index
    %c0_36 = arith.constant 0 : index
    %48 = vector.load %arg13[%c0_35, %c0_36] : memref<128x128xbf16, #tpu.memory_space<vmem>>, vector<128x128xbf16>
    %cst_37 = arith.constant dense<0.000000e+00> : vector<128x128xf32>
    %49 = tpu.matmul %47, %48, %cst_37 {dimension_numbers = #tpu.dot_dimension_numbers<[1], [0], [0], [1], [0, 0, 1, 1], [], []>} : vector<128x128xbf16>, vector<128x128xbf16>, vector<128x128xf32> -> vector<128x128xf32>
    %c0_38 = arith.constant 0 : index
    %c0_39 = arith.constant 0 : index
    %50 = vector.load %arg14[%c0_38, %c0_39] : memref<1x128xf32, #tpu.memory_space<vmem>>, vector<1x128xf32>
    %51 = vector.broadcast %50 : vector<1x128xf32> to vector<128x128xf32>
    %52 = arith.addf %49, %51 : vector<128x128xf32>
    %53 = arith.truncf %52 : vector<128x128xf32> to vector<128x128xbf16>
    %54 = arith.extf %53 : vector<128x128xbf16> to vector<128x128xf32>
    %c0_40 = arith.constant 0 : index
    %c0_41 = arith.constant 0 : index
    %55 = vector.load %arg2[%c0_40, %c0_41] : memref<128x1xi32, #tpu.memory_space<vmem>>, vector<128x1xi32>
    %c0_i32 = arith.constant 0 : i32
    %56 = vector.broadcast %c0_i32 : i32 to vector<128x1xi32>
    %57 = arith.cmpi eq, %55, %56 : vector<128x1xi32>
    %cst_42 = arith.constant 0xFF800000 : f32
    %58 = vector.shape_cast %57 : vector<128x1xi1> to vector<128x1xi1>
    %59 = vector.broadcast %58 : vector<128x1xi1> to vector<128x128xi1>
    %60 = vector.broadcast %cst_42 : f32 to vector<128x128xf32>
    %61 = arith.select %59, %54, %60 : vector<128x128xi1>, vector<128x128xf32>
    %cst_43 = arith.constant dense<0xFF800000> : vector<128xf32>
    %62 = vector.multi_reduction <maximumf>, %61, %cst_43 [0] : vector<128x128xf32> to vector<128xf32>
    %63 = vector.shape_cast %62 : vector<128xf32> to vector<1x128xf32>
    %c0_44 = arith.constant 0 : index
    %c0_45 = arith.constant 0 : index
    %64 = vector.load %arg18[%c0_44, %c0_45] : memref<2x128xf32, #tpu.memory_space<vmem>>, vector<1x128xf32>
    tpu.vector_store %arg18[%c0_44, %c0_45], %63 {strides = array<i32>} : memref<2x128xf32, #tpu.memory_space<vmem>>, vector<1x128xf32>,
    %c1_i32 = arith.constant 1 : i32
    %65 = vector.broadcast %c1_i32 : i32 to vector<128x1xi32>
    %66 = arith.cmpi eq, %55, %65 : vector<128x1xi32>
    %cst_46 = arith.constant 0xFF800000 : f32
    %67 = vector.shape_cast %66 : vector<128x1xi1> to vector<128x1xi1>
    %68 = vector.broadcast %67 : vector<128x1xi1> to vector<128x128xi1>
    %69 = vector.broadcast %cst_46 : f32 to vector<128x128xf32>
    %70 = arith.select %68, %54, %69 : vector<128x128xi1>, vector<128x128xf32>
    %cst_47 = arith.constant dense<0xFF800000> : vector<128xf32>
    %71 = vector.multi_reduction <maximumf>, %70, %cst_47 [0] : vector<128x128xf32> to vector<128xf32>
    %72 = vector.shape_cast %71 : vector<128xf32> to vector<1x128xf32>
    %c1 = arith.constant 1 : index
    %c0_48 = arith.constant 0 : index
    %73 = vector.load %arg18[%c1, %c0_48] : memref<2x128xf32, #tpu.memory_space<vmem>>, vector<1x128xf32>
    tpu.vector_store %arg18[%c1, %c0_48], %72 {strides = array<i32>} : memref<2x128xf32, #tpu.memory_space<vmem>>, vector<1x128xf32>,
    %c0_49 = arith.constant 0 : index
    %c0_50 = arith.constant 0 : index
    %74 = vector.load %arg18[%c0_49, %c0_50] : memref<2x128xf32, #tpu.memory_space<vmem>>, vector<2x128xf32>
    %75 = arith.truncf %74 : vector<2x128xf32> to vector<2x128xbf16>
    %c0_51 = arith.constant 0 : index
    %c0_52 = arith.constant 0 : index
    %76 = vector.load %arg15[%c0_51, %c0_52] : memref<128x128xbf16, #tpu.memory_space<vmem>>, vector<128x128xbf16>
    %cst_53 = arith.constant dense<0.000000e+00> : vector<2x128xf32>
    %77 = tpu.matmul %75, %76, %cst_53 {dimension_numbers = #tpu.dot_dimension_numbers<[1], [0], [0], [1], [0, 0, 1, 1], [], []>} : vector<2x128xbf16>, vector<128x128xbf16>, vector<2x128xf32> -> vector<2x128xf32>
    %c0_54 = arith.constant 0 : index
    %c0_55 = arith.constant 0 : index
    %78 = vector.load %arg16[%c0_54, %c0_55] : memref<1x128xf32, #tpu.memory_space<vmem>>, vector<1x128xf32>
    %79 = vector.broadcast %78 : vector<1x128xf32> to vector<2x128xf32>
    %80 = arith.addf %77, %79 : vector<2x128xf32>
    %c0_56 = arith.constant 0 : index
    %c0_57 = arith.constant 0 : index
    %81 = vector.load %arg17[%c0_56, %c0_57] : memref<2x128xf32, #tpu.memory_space<vmem>>, vector<2x128xf32>
    tpu.vector_store %arg17[%c0_56, %c0_57], %80 {strides = array<i32>} : memref<2x128xf32, #tpu.memory_space<vmem>>, vector<2x128xf32>,
    return
  }
}

</mosaic_0001>

<bundles_post_ra>
// kernel: tpu_custom_call.1
= control target key start
LH: loop header
LB: loop body
LE: loop exit
PB: predicated region body
PF: predicated region fallthrough
CT: control target
= control target key end

     0   :  { %s3582_s0 = inlined_call_operand.vmem [shape: bf16[128,128], index: 0, kind: input, shape index: {}]   ;;  %s3583_s1 = inlined_call_operand.vmem [shape: bf16[128,128], index: 1, kind: input, shape index: {}]   ;;  %s3584_s2 = inlined_call_operand.vmem [shape: s32[128,1], index: 2, kind: input, shape index: {}]   ;;  %s3585_s3 = inlined_call_operand.hbm [shape: bf16[128,128], index: 3, kind: input, shape index: {}]   ;;  %s3586_s4 = inlined_call_operand.vmem [shape: f32[1,128], index: 4, kind: input, shape index: {}]   ;;  %s3587_s5 = inlined_call_operand.hbm [shape: bf16[128,128], index: 5, kind: input, shape index: {}]   ;;  %s3588_s6 = inlined_call_operand.vmem [shape: f32[1,128], index: 6, kind: input, shape index: {}]   ;;  %s3589_s7 = inlined_call_operand.hbm [shape: bf16[128,128], index: 7, kind: input, shape index: {}]   ;;  %s3590_s8 = inlined_call_operand.vmem [shape: f32[1,128], index: 8, kind: input, shape index: {}]   ;;  %s3591_s9 = inlined_call_operand.hbm [shape: bf16[128,128], index: 9, kind: input, shape index: {}]   ;;  %s3592_s10 = inlined_call_operand.vmem [shape: f32[1,128], index: 10, kind: input, shape index: {}]   ;;  %s3593_s11 = inlined_call_operand.hbm [shape: bf16[128,128], index: 11, kind: input, shape index: {}]   ;;  %s3594_s12 = inlined_call_operand.vmem [shape: f32[1,128], index: 12, kind: input, shape index: {}]   ;;  %s3595_s13 = inlined_call_operand.hbm [shape: bf16[128,128], index: 13, kind: input, shape index: {}]   ;;  %s3596_s14 = inlined_call_operand.vmem [shape: f32[1,128], index: 14, kind: input, shape index: {}]   ;;  %s3597_s15 = inlined_call_operand.hbm [shape: bf16[128,128], index: 15, kind: input, shape index: {}]   ;;  %s3598_s16 = inlined_call_operand.vmem [shape: f32[1,128], index: 16, kind: input, shape index: {}]   ;;  %s3599_s17 = inlined_call_operand.hbm [shape: f32[2,128], index: 17, kind: output, shape index: {}]  }
   0x1   :  { %3602 = sst [smem:[#allocation21_spill]] %s3582_s0 }
   0x2   :  { %3603 = sst [smem:[#allocation22_spill]] %s3583_s1 }
   0x3   :  { %22 = vsyncpa [#allocation4], 0 }
   0x4   :  { %23 = vsyncpa [#allocation7], 0 }
   0x5   :  { %24 = vsyncpa [#allocation10], 0 }
   0x6   :  { %25 = vsyncpa [#allocation13], 0 }
   0x7   :  { %26 = vsyncpa [#allocation5], 0  ;;  %s2981_s24 = smov [#allocation6]   ;;  %s2982_s26 = smov [#allocation9]  }
   0x8   :  { %s52_s25 = sshll.u32 %s2981_s24, 4  ;;  %s80_s27 = sshll.u32 %s2982_s26, 4  ;;  %s53_s25 = int_to_ptr.vmem [resolvable:$true] %s52_s25  ;;  %s3084_s27 = int_to_ptr.vmem [resolvable:$true] %s80_s27 }
   0x9   :  { %s2795_s0 = scalar_lea.hbm %s3587_s5, 1024 }
   0xa   :  { %p2796_p0 = scmp.ne.s32.totalorder %s3587_s5, %s2795_s0  ;;  %p2799_p1 = scmp.lt.u32.totalorder %s2795_s0, %s3587_s5 }
   0xc   :  { %p2801_p2 = pnand %p2799_p1, %p2796_p0 }
   0xe   :  { %2804 = shalt.err (!%p2801_p2)
}
   0xf   :  { %s2805_s20 = scalar_lea.vmem %s53_s25, 1024  ;;  %p2810_p4 = scmp.lt.s32.totalorder %s53_s25, %s53_s25 }
  0x10   :  { %p2806_p3 = scmp.ne.s32.totalorder %s53_s25, %s2805_s20  ;;  %p2811_p5 = scmp.lt.s32.totalorder %s2805_s20, %s2805_s20 }
  0x12   :  { %p2812_p6 = por %p2811_p5, %p2810_p4 }
  0x14   :  { %p2813_p7 = pnand %p2812_p6, %p2806_p3 }
  0x16   :  { %2816 = shalt.err (!%p2813_p7)
}
  0x17   :  { %s2983_s21 = smov 64   ;;  %s2984_s22 = smov 4  }
  0x18   :  { %58 = dma.hbm_to_vmem [thread:$0]  %s3587_s5, 1024, %s53_s25, [#allocation7], %s2983_s21, %s2983_s21, %s2984_s22  }
  0x19   :  { %s2817_s29 = scalar_lea.hbm %s3591_s9, 1024 }
  0x1a   :  { %p2818_p8 = scmp.ne.s32.totalorder %s3591_s9, %s2817_s29  ;;  %p2821_p9 = scmp.lt.u32.totalorder %s2817_s29, %s3591_s9 }
  0x1c   :  { %p2823_p10 = pnand %p2821_p9, %p2818_p8 }
  0x1e   :  { %2826 = shalt.err (!%p2823_p10)
}
  0x1f   :  { %s2827_s1 = scalar_lea.vmem %s3084_s27, 1024  ;;  %p2832_p12 = scmp.lt.s32.totalorder %s3084_s27, %s3084_s27 }
  0x20   :  { %p2828_p11 = scmp.ne.s32.totalorder %s3084_s27, %s2827_s1  ;;  %p2833_p13 = scmp.lt.s32.totalorder %s2827_s1, %s2827_s1 }
  0x22   :  { %p2834_p0 = por %p2833_p13, %p2832_p12 }
  0x24   :  { %p2835_p1 = pnand %p2834_p0, %p2828_p11 }
  0x26   :  { %2838 = shalt.err (!%p2835_p1)
}
  0x27   :  { %86 = dma.hbm_to_vmem [thread:$0]  %s3591_s9, 1024, %s3084_s27, [#allocation10], %s2983_s21, %s2983_s21, %s2984_s22  }
  0x28   :  { %s2985_s20 = smov [#allocation12]   ;;  %s2986_s24 = smov [#allocation3]  }
  0x29   :  { %s108_s23 = sshll.u32 %s2985_s20, 4  ;;  %s38_s26 = sshll.u32 %s2986_s24, 4  ;;  %s109_s23 = int_to_ptr.vmem [resolvable:$true] %s108_s23  ;;  %s3121_s26 = int_to_ptr.vmem [resolvable:$true] %s38_s26 }
  0x2a   :  { %s2839_s0 = scalar_lea.hbm %s3595_s13, 1024 }
  0x2b   :  { %p2840_p2 = scmp.ne.s32.totalorder %s3595_s13, %s2839_s0  ;;  %p2843_p3 = scmp.lt.u32.totalorder %s2839_s0, %s3595_s13 }
  0x2d   :  { %p2845_p4 = pnand %p2843_p3, %p2840_p2 }
  0x2f   :  { %2848 = shalt.err (!%p2845_p4)
}
  0x30   :  { %s2849_s9 = scalar_lea.vmem %s109_s23, 1024  ;;  %p2854_p6 = scmp.lt.s32.totalorder %s109_s23, %s109_s23 }
  0x31   :  { %p2850_p5 = scmp.ne.s32.totalorder %s109_s23, %s2849_s9  ;;  %p2855_p7 = scmp.lt.s32.totalorder %s2849_s9, %s2849_s9 }
  0x33   :  { %p2856_p8 = por %p2855_p7, %p2854_p6 }
  0x35   :  { %p2857_p9 = pnand %p2856_p8, %p2850_p5 }
  0x37   :  { %2860 = shalt.err (!%p2857_p9)
}
  0x38   :  { %114 = dma.hbm_to_vmem [thread:$0]  %s3595_s13, 1024, %s109_s23, [#allocation13], %s2983_s21, %s2983_s21, %s2984_s22  }
  0x39   :  { %s2861_s24 = scalar_lea.hbm %s3585_s3, 1024 }
  0x3a   :  { %p2862_p10 = scmp.ne.s32.totalorder %s3585_s3, %s2861_s24  ;;  %p2865_p11 = scmp.lt.u32.totalorder %s2861_s24, %s3585_s3 }
  0x3c   :  { %p2867_p12 = pnand %p2865_p11, %p2862_p10 }
  0x3e   :  { %2870 = shalt.err (!%p2867_p12)
}
  0x3f   :  { %s2871_s18 = scalar_lea.vmem %s3121_s26, 1024  ;;  %p2876_p0 = scmp.lt.s32.totalorder %s3121_s26, %s3121_s26 }
  0x40   :  { %p2872_p13 = scmp.ne.s32.totalorder %s3121_s26, %s2871_s18  ;;  %p2877_p1 = scmp.lt.s32.totalorder %s2871_s18, %s2871_s18 }
  0x42   :  { %p2878_p2 = por %p2877_p1, %p2876_p0 }
  0x44   :  { %p2879_p3 = pnand %p2878_p2, %p2872_p13 }
  0x46   :  { %2882 = shalt.err (!%p2879_p3)
}
  0x47   :  { %44 = dma.hbm_to_vmem [thread:$0]  %s3585_s3, 1024, %s3121_s26, [#allocation4], %s2983_s21, %s2983_s21, %s2984_s22  }
  0x48   :  { %s2987_s19 = smov [#allocation8]   ;;  %s2988_s9 = smov [#allocation11]  }
  0x49   :  { %s66_s1 = sshll.u32 %s2987_s19, 4  ;;  %s94_s27 = sshll.u32 %s2988_s9, 4  ;;  %s67_s1 = int_to_ptr.vmem [resolvable:$true] %s66_s1  ;;  %s3158_s27 = int_to_ptr.vmem [resolvable:$true] %s94_s27 }
  0x4a   :  { %s2883_s20 = scalar_lea.hbm %s3589_s7, 1024 }
  0x4b   :  { %p2884_p4 = scmp.ne.s32.totalorder %s3589_s7, %s2883_s20  ;;  %p2887_p5 = scmp.lt.u32.totalorder %s2883_s20, %s3589_s7 }
  0x4d   :  { %p2889_p6 = pnand %p2887_p5, %p2884_p4 }
  0x4f   :  { %2892 = shalt.err (!%p2889_p6)
}
  0x50   :  { %s2893_s3 = scalar_lea.vmem %s67_s1, 1024  ;;  %p2898_p8 = scmp.lt.s32.totalorder %s67_s1, %s67_s1 }
  0x51   :  { %p2894_p7 = scmp.ne.s32.totalorder %s67_s1, %s2893_s3  ;;  %p2899_p9 = scmp.lt.s32.totalorder %s2893_s3, %s2893_s3 }
  0x53   :  { %p2900_p10 = por %p2899_p9, %p2898_p8 }
  0x55   :  { %p2901_p11 = pnand %p2900_p10, %p2894_p7 }
  0x57   :  { %2904 = shalt.err (!%p2901_p11)
}
  0x58   :  { %72 = dma.hbm_to_vmem [thread:$0]  %s3589_s7, 1024, %s67_s1, [#allocation7], %s2983_s21, %s2983_s21, %s2984_s22  }
  0x59   :  { %s2905_s23 = scalar_lea.hbm %s3593_s11, 1024 }
  0x5a   :  { %p2906_p12 = scmp.ne.s32.totalorder %s3593_s11, %s2905_s23  ;;  %p2909_p13 = scmp.lt.u32.totalorder %s2905_s23, %s3593_s11 }
  0x5c   :  { %p2911_p0 = pnand %p2909_p13, %p2906_p12 }
  0x5e   :  { %2914 = shalt.err (!%p2911_p0)
}
  0x5f   :  { %s2915_s20 = scalar_lea.vmem %s3158_s27, 1024  ;;  %p2920_p2 = scmp.lt.s32.totalorder %s3158_s27, %s3158_s27 }
  0x60   :  { %p2916_p1 = scmp.ne.s32.totalorder %s3158_s27, %s2915_s20  ;;  %p2921_p3 = scmp.lt.s32.totalorder %s2915_s20, %s2915_s20 }
  0x62   :  { %p2922_p4 = por %p2921_p3, %p2920_p2 }
  0x64   :  { %p2923_p5 = pnand %p2922_p4, %p2916_p1 }
  0x66   :  { %2926 = shalt.err (!%p2923_p5)
}
  0x67   :  { %100 = dma.hbm_to_vmem [thread:$0]  %s3593_s11, 1024, %s3158_s27, [#allocation10], %s2983_s21, %s2983_s21, %s2984_s22  }
  0x68   :  { %s2989_s24 = smov [#allocation14]   ;;  %s2927_s3 = scalar_lea.hbm %s3597_s15, 1024 }
  0x69   :  { %s122_s28 = sshll.u32 %s2989_s24, 4  ;;  %p2928_p6 = scmp.ne.s32.totalorder %s3597_s15, %s2927_s3  ;;  %s123_s28 = int_to_ptr.vmem [resolvable:$true] %s122_s28 }
  0x6a   :  { %p2931_p7 = scmp.lt.u32.totalorder %s2927_s3, %s3597_s15 }
  0x6c   :  { %p2933_p8 = pnand %p2931_p7, %p2928_p6 }
  0x6e   :  { %2936 = shalt.err (!%p2933_p8)
}
  0x6f   :  { %s2937_s23 = scalar_lea.vmem %s123_s28, 1024  ;;  %p2942_p10 = scmp.lt.s32.totalorder %s123_s28, %s123_s28 }
  0x70   :  { %p2938_p9 = scmp.ne.s32.totalorder %s123_s28, %s2937_s23  ;;  %p2943_p11 = scmp.lt.s32.totalorder %s2937_s23, %s2937_s23 }
  0x72   :  { %p2944_p12 = por %p2943_p11, %p2942_p10 }
  0x74   :  { %p2945_p13 = pnand %p2944_p12, %p2938_p9 }
  0x76   :  { %2948 = shalt.err (!%p2945_p13)
}
  0x77   :  { %128 = dma.hbm_to_vmem [thread:$0]  %s3597_s15, 1024, %s123_s28, [#allocation13], %s2983_s21, %s2983_s21, %s2984_s22  }
  0x78   :  { %2971 = dma.done.wait [#allocation4], 1024  }
  0x79   :  { %2972 = vsyncadd [#allocation4], 4294966272 }
  0x7a   :  { %2973 = dma.done.wait [#allocation7], 2048  }
  0x7b   :  { %2974 = vsyncadd [#allocation7], 4294965248 }
  0x7c   :  { %2975 = dma.done.wait [#allocation10], 2048  }
  0x7d   :  { %2976 = vsyncadd [#allocation10], 4294965248 }
  0x7e   :  { %2977 = dma.done.wait [#allocation13], 2048  }
  0x7f   :  { %2978 = vsyncadd [#allocation13], 4294965248  ;;  %s3604_s5 = sld [smem:[#allocation22_spill]]  ;;  %s3605_s28 = sld [smem:[#allocation21_spill]]  ;;  %v2735_v7 = vld [vmem:[#allocation3] sm:$0xff]   ;;  %v2736_v8 = vld [vmem:[#allocation3 + $0x8] sm:$0xff]  }
  0x80   :  { %2428 = vmatprep.subr.bf16.mxu1 %v2735_v7  ;;  %v2737_v10 = vld [vmem:[#allocation3 + $0x10] sm:$0xff]   ;;  %v2738_v12 = vld [vmem:[#allocation3 + $0x18] sm:$0xff]   ;;  %v2739_v13 = vld [vmem:[#allocation3 + $0x20] sm:$0xff]   ;;  %s2993_s29 = smov [#allocation15]  }
  0x81   :  { %2429 = vmatpush3.bf16.msra.mxu1 %v2735_v7  ;;  %v2740_v16 = vld [vmem:[#allocation3 + $0x28] sm:$0xff]   ;;  %v2741_v17 = vld [vmem:[#allocation3 + $0x30] sm:$0xff]   ;;  %v2742_v23 = vld [vmem:[#allocation3 + $0x38] sm:$0xff]   ;;  %s2152_s0 = sshll.u32 %s2993_s29, 4  ;;  %s2153_s0 = int_to_ptr.vmem [resolvable:$true] %s2152_s0 }
  0x82   :  { %2430 = vmatprep.subr.bf16.mxu1 %v2736_v8  ;;  %v2743_v24 = vld [vmem:[#allocation6] sm:$0xff]   ;;  %v2744_v25 = vld [vmem:[#allocation6 + $0x8] sm:$0xff]   ;;  %v2745_v26 = vld [vmem:[#allocation6 + $0x10] sm:$0xff]   ;;  %s2949_s3 = scalar_lea.vmem %s2153_s0, 32  ;;  %p2954_p1 = scmp.lt.s32.totalorder %s2153_s0, %s2153_s0 }
  0x83   :  { %v2746_v27 = vld [vmem:[#allocation6 + $0x18] sm:$0xff]   ;;  %v2747_v28 = vld [vmem:[#allocation6 + $0x20] sm:$0xff]   ;;  %v2748_v29 = vld [vmem:[#allocation6 + $0x28] sm:$0xff]   ;;  %p2950_p0 = scmp.ne.s32.totalorder %s2153_s0, %s2949_s3  ;;  %p2955_p2 = scmp.lt.s32.totalorder %s2949_s3, %s2949_s3 }
  0x84   :  { %v2749_v54 = vld [vmem:[#allocation6 + $0x30] sm:$0xff]   ;;  %v2750_v55 = vld [vmem:[#allocation6 + $0x38] sm:$0xff]  }
  0x85   :  { %v2719_v0 = vld [vmem:[%s3604_s5] sm:$0xff]   ;;  %v2720_v1 = vld [vmem:[%s3604_s5 + $0x8] sm:$0xff]   ;;  %v2721_v2 = vld [vmem:[%s3604_s5 + $0x10] sm:$0xff]   ;;  %2431 = vmatpush3.bf16.msra.mxu1 %v2736_v8  ;;  %p2956_p3 = por %p2955_p2, %p2954_p1 }
  0x86   :  { %2396 = vmatprep.subr.bf16.mxu0 %v2719_v0  ;;  %v2722_v3 = vld [vmem:[%s3604_s5 + $0x18] sm:$0xff]   ;;  %v3225_v4 = vld [vmem:[%s3605_s28] sm:$0xff]   ;;  %v2724_v6 = vld [vmem:[%s3604_s5 + $0x28] sm:$0xff]   ;;  %2432 = vmatprep.subr.bf16.mxu1 %v2737_v10 }
  0x87   :  { %2397 = vmatpush3.bf16.msra.mxu0 %v2719_v0  ;;  %2412 = vmatprep.mubr.bf16.mxu0 %v3225_v4  ;;  %v2723_v5 = vld [vmem:[%s3604_s5 + $0x20] sm:$0xff]   ;;  %v2725_v9 = vld [vmem:[%s3604_s5 + $0x30] sm:$0xff]   ;;  %v2726_v11 = vld [vmem:[%s3604_s5 + $0x38] sm:$0xff]   ;;  %p2957_p4 = pnand %p2956_p3, %p2950_p0 }
  0x88   :  { %2398 = vmatprep.subr.bf16.mxu0 %v2720_v1  ;;  %v3243_v14 = vld [vmem:[%s3605_s28 + $0x8] sm:$0xff]   ;;  %v3248_v15 = vld [vmem:[%s3605_s28 + $0x10] sm:$0xff]   ;;  %v3255_v18 = vld [vmem:[%s3605_s28 + $0x18] sm:$0xff]  }
  0x89   :  { %2433 = vmatpush3.bf16.msra.mxu1 %v2737_v10  ;;  %v3260_v19 = vld [vmem:[%s3605_s28 + $0x20] sm:$0xff]   ;;  %v3267_v20 = vld [vmem:[%s3605_s28 + $0x28] sm:$0xff]   ;;  %v3272_v21 = vld [vmem:[%s3605_s28 + $0x30] sm:$0xff]  }
  0x8a   :  { %2434 = vmatprep.subr.bf16.mxu1 %v2738_v12  ;;  %v3279_v22 = vld [vmem:[%s3605_s28 + $0x38] sm:$0xff]   ;;  %v2180_v56 = vld [vmem:[%s3586_s4] ss:$0 sm:$0xff] }
  0x8b   :  { %2399 = vmatpush3.bf16.msra.mxu0 %v2720_v1 }
  0x8c   :  { %2400 = vmatprep.subr.bf16.mxu0 %v2721_v2 }
  0x8d   :  { %2435 = vmatpush3.bf16.msra.mxu1 %v2738_v12 }
  0x8e   :  { %2436 = vmatprep.subr.bf16.mxu1 %v2739_v13 }
  0x8f   :  { %2401 = vmatpush3.bf16.msra.mxu0 %v2721_v2 }
  0x90   :  { %2402 = vmatprep.subr.bf16.mxu0 %v2722_v3 }
  0x91   :  { %2437 = vmatpush3.bf16.msra.mxu1 %v2739_v13 }
  0x92   :  { %2438 = vmatprep.subr.bf16.mxu1 %v2740_v16 }
  0x93   :  { %2403 = vmatpush3.bf16.msra.mxu0 %v2722_v3 }
  0x94   :  { %2404 = vmatprep.subr.bf16.mxu0 %v2723_v5 }
  0x95   :  { %2439 = vmatpush3.bf16.msra.mxu1 %v2740_v16 }
  0x96   :  { %2440 = vmatprep.subr.bf16.mxu1 %v2741_v17 }
  0x97   :  { %2405 = vmatpush3.bf16.msra.mxu0 %v2723_v5 }
  0x98   :  { %2406 = vmatprep.subr.bf16.mxu0 %v2724_v6 }
  0x99   :  { %2441 = vmatpush3.bf16.msra.mxu1 %v2741_v17 }
  0x9a   :  { %2442 = vmatprep.subr.bf16.mxu1 %v2742_v23 }
  0x9b   :  { %2407 = vmatpush3.bf16.msra.mxu0 %v2724_v6 }
  0x9c   :  { %2408 = vmatprep.subr.bf16.mxu0 %v2725_v9 }
  0x9d   :  { %2443 = vmatpush3.bf16.msra.mxu1 %v2742_v23 }
  0x9f   :  { %2409 = vmatpush3.bf16.msra.mxu0 %v2725_v9 }
  0xa0   :  { %2410 = vmatprep.subr.bf16.mxu0 %v2726_v11 }
  0xa3   :  { %2411 = vmatpush3.bf16.msra.mxu0 %v2726_v11 }
  0xa4   :  { %2460 = vmatprep.subr.bf16.mxu0 %v2743_v24 }
  0xa6   :  { %2413 = vmatmul.mubr.bf16.vlgmr.msra.gmra.mrb[0].mxu0 %v3243_v14 }
  0xa7   :  { %2416 = vmatprep.mubr.bf16.mxu0 %v3248_v15  ;;  %2461 = vmatpush3.bf16.msra.mxu0 %v2743_v24 }
  0xa8   :  { %2462 = vmatprep.subr.bf16.mxu0 %v2744_v25 }
  0xab   :  { %2463 = vmatpush3.bf16.msra.mxu0 %v2744_v25 }
  0xac   :  { %2464 = vmatprep.subr.bf16.mxu0 %v2745_v26 }
  0xae   :  { %2417 = vmatmul.mubr.bf16.gmra.mrb[4].mxu0 %v3255_v18 }
  0xaf   :  { %2420 = vmatprep.mubr.bf16.mxu0 %v3260_v19  ;;  %2465 = vmatpush3.bf16.msra.mxu0 %v2745_v26 }
  0xb0   :  { %2466 = vmatprep.subr.bf16.mxu0 %v2746_v27 }
  0xb3   :  { %2467 = vmatpush3.bf16.msra.mxu0 %v2746_v27 }
  0xb4   :  { %2468 = vmatprep.subr.bf16.mxu0 %v2747_v28 }
  0xb6   :  { %2421 = vmatmul.mubr.bf16.gmra.mrb[8].mxu0 %v3267_v20 }
  0xb7   :  { %2424 = vmatprep.mubr.bf16.mxu0 %v3272_v21  ;;  %2469 = vmatpush3.bf16.msra.mxu0 %v2747_v28 }
  0xb8   :  { %2470 = vmatprep.subr.bf16.mxu0 %v2748_v29 }
  0xbb   :  { %2471 = vmatpush3.bf16.msra.mxu0 %v2748_v29 }
  0xbc   :  { %2472 = vmatprep.subr.bf16.mxu0 %v2749_v54 }
  0xbe   :  { %2425 = vmatmul.mubr.bf16.gmra.mrb[12].mxu0 %v3279_v22 }
  0xbf   :  { %2473 = vmatpush3.bf16.msra.mxu0 %v2749_v54 }
  0xc0   :  { %2474 = vmatprep.subr.bf16.mxu0 %v2750_v55 }
  0xc3   :  { %2475 = vmatpush3.bf16.msra.mxu0 %v2750_v55 }
 0x179   :  { %v2414_v30 = vpop.f32.mrb[0].mxu0 }
 0x17a   :  { %v315_v31 = vpop.f32.mrb[1].mxu0 }
 0x17b   :  { %v2415_v32 = vpop.f32.mrb[2].mxu0 }
 0x17c   :  { %v379_v33 = vpack.c.bf16 %v2415_v32, %v2414_v30  ;;  %v318_v34 = vpop.f32.mrb[3].mxu0 }
 0x17d   :  { %v378_v35 = vpack.c.bf16 %v318_v34, %v315_v31 }
 0x17f   :  { %2444 = vmatprep.mubr.bf16.mxu1 %v378_v35 }
 0x180   :  { %2445 = vmatmul.mubr.bf16.vlgmr.msra.gmra.mrb[0].mxu1 %v379_v33 }
 0x181   :  { %v2418_v36 = vpop.f32.mrb[4].mxu0 }
 0x182   :  { %v331_v37 = vpop.f32.mrb[5].mxu0 }
 0x183   :  { %v2419_v38 = vpop.f32.mrb[6].mxu0 }
 0x184   :  { %v381_v39 = vpack.c.bf16 %v2419_v38, %v2418_v36  ;;  %v334_v40 = vpop.f32.mrb[7].mxu0 }
 0x185   :  { %v380_v41 = vpack.c.bf16 %v334_v40, %v331_v37 }
 0x187   :  { %2448 = vmatprep.mubr.bf16.mxu1 %v380_v41 }
 0x188   :  { %2449 = vmatmul.mubr.bf16.gmra.mrb[4].mxu1 %v381_v39 }
 0x189   :  { %v2422_v42 = vpop.f32.mrb[8].mxu0 }
 0x18a   :  { %v347_v43 = vpop.f32.mrb[9].mxu0 }
 0x18b   :  { %v2423_v44 = vpop.f32.mrb[10].mxu0 }
 0x18c   :  { %v383_v45 = vpack.c.bf16 %v2423_v44, %v2422_v42  ;;  %v350_v46 = vpop.f32.mrb[11].mxu0 }
 0x18d   :  { %v382_v47 = vpack.c.bf16 %v350_v46, %v347_v43 }
 0x18f   :  { %2452 = vmatprep.mubr.bf16.mxu1 %v382_v47 }
 0x190   :  { %2453 = vmatmul.mubr.bf16.gmra.mrb[8].mxu1 %v383_v45 }
 0x191   :  { %v2426_v48 = vpop.f32.mrb[12].mxu0 }
 0x192   :  { %v363_v49 = vpop.f32.mrb[13].mxu0 }
 0x193   :  { %v2427_v50 = vpop.f32.mrb[14].mxu0 }
 0x194   :  { %v385_v51 = vpack.c.bf16 %v2427_v50, %v2426_v48  ;;  %v366_v52 = vpop.f32.mrb[15].mxu0 }
 0x195   :  { %v384_v53 = vpack.c.bf16 %v366_v52, %v363_v49 }
 0x197   :  { %2456 = vmatprep.mubr.bf16.mxu1 %v384_v53 }
 0x198   :  { %2457 = vmatmul.mubr.bf16.gmra.mrb[12].mxu1 %v385_v51 }
 0x199   :  { %2508 = vmatprep.mubr.bf16.mxu1 %v3225_v4 }
 0x253   :  { %v2446_v57 = vpop.f32.mrb[0].mxu1 }
 0x254   :  { %v500_v58 = vadd.f32 %v2446_v57, %v2180_v56  ;;  %v491_v59 = vpop.f32.mrb[1].mxu1 }
 0x255   :  { %v492_v60 = vadd.f32 %v2180_v56, %v491_v59  ;;  %v2447_v61 = vpop.f32.mrb[2].mxu1  ;;  %v2752_v59 = vld [vmem:[#allocation8 + $0x8] sm:$0xff]  }
 0x256   :  { %v503_v62 = vadd.f32 %v2447_v61, %v2180_v56  ;;  %v494_v63 = vpop.f32.mrb[3].mxu1  ;;  %v556_v1 = vmax.f32 %v500_v58, 0.0  ;;  %v2751_v58 = vld [vmem:[#allocation8] sm:$0xff]   ;;  %v2754_v61 = vld [vmem:[#allocation8 + $0x18] sm:$0xff]  }
 0x257   :  { %v495_v0 = vadd.f32 %v2180_v56, %v494_v63  ;;  %v554_v3 = vmax.f32 %v492_v60, 0.0  ;;  %2524 = vmatprep.subr.bf16.mxu0 %v2751_v58  ;;  %v2753_v60 = vld [vmem:[#allocation8 + $0x10] sm:$0xff]  }
 0x258   :  { %v557_v2 = vmax.f32 %v503_v62, 0.0  ;;  %v2756_v62 = vld [vmem:[#allocation8 + $0x28] sm:$0xff]   ;;  %v2757_v63 = vld [vmem:[#allocation8 + $0x30] sm:$0xff]  }
 0x259   :  { %v555_v5 = vmax.f32 %v495_v0, 0.0  ;;  %v2189_v0 = vld [vmem:[%s3588_s6] ss:$0 sm:$0xff] }
 0x25a   :  { %v571_v6 = vpack.c.bf16 %v557_v2, %v556_v1 }
 0x25b   :  { %v570_v7 = vpack.c.bf16 %v555_v5, %v554_v3  ;;  %v2450_v8 = vpop.f32.mrb[4].mxu1 }
 0x25c   :  { %v516_v9 = vadd.f32 %v2450_v8, %v2180_v56  ;;  %v507_v10 = vpop.f32.mrb[5].mxu1 }
 0x25d   :  { %v508_v11 = vadd.f32 %v2180_v56, %v507_v10  ;;  %v2451_v12 = vpop.f32.mrb[6].mxu1  ;;  %2476 = vmatprep.mubr.bf16.mxu0 %v570_v7 }
 0x25e   :  { %v519_v13 = vadd.f32 %v2451_v12, %v2180_v56  ;;  %v510_v16 = vpop.f32.mrb[7].mxu1  ;;  %2477 = vmatmul.mubr.bf16.vlgmr.msra.gmra.mrb[16].mxu0 %v571_v6  ;;  %v560_v23 = vmax.f32 %v516_v9, 0.0 }
 0x25f   :  { %v511_v17 = vadd.f32 %v2180_v56, %v510_v16  ;;  %v558_v25 = vmax.f32 %v508_v11, 0.0  ;;  %2525 = vmatpush3.bf16.msra.mxu0 %v2751_v58 }
 0x260   :  { %v561_v24 = vmax.f32 %v519_v13, 0.0  ;;  %2526 = vmatprep.subr.bf16.mxu0 %v2752_v59 }
 0x261   :  { %v559_v26 = vmax.f32 %v511_v17, 0.0 }
 0x262   :  { %v573_v27 = vpack.c.bf16 %v561_v24, %v560_v23 }
 0x263   :  { %v572_v28 = vpack.c.bf16 %v559_v26, %v558_v25  ;;  %v2454_v29 = vpop.f32.mrb[8].mxu1  ;;  %2527 = vmatpush3.bf16.msra.mxu0 %v2752_v59 }
 0x264   :  { %v532_v30 = vadd.f32 %v2454_v29, %v2180_v56  ;;  %v523_v31 = vpop.f32.mrb[9].mxu1  ;;  %2528 = vmatprep.subr.bf16.mxu0 %v2753_v60 }
 0x265   :  { %v524_v32 = vadd.f32 %v2180_v56, %v523_v31  ;;  %v2455_v33 = vpop.f32.mrb[10].mxu1  ;;  %2480 = vmatprep.mubr.bf16.mxu0 %v572_v28 }
 0x266   :  { %v535_v34 = vadd.f32 %v2455_v33, %v2180_v56  ;;  %v526_v35 = vpop.f32.mrb[11].mxu1  ;;  %2481 = vmatmul.mubr.bf16.gmra.mrb[20].mxu0 %v573_v27  ;;  %v564_v37 = vmax.f32 %v532_v30, 0.0 }
 0x267   :  { %v527_v36 = vadd.f32 %v2180_v56, %v526_v35  ;;  %v562_v39 = vmax.f32 %v524_v32, 0.0  ;;  %2529 = vmatpush3.bf16.msra.mxu0 %v2753_v60 }
 0x268   :  { %v565_v38 = vmax.f32 %v535_v34, 0.0  ;;  %2530 = vmatprep.subr.bf16.mxu0 %v2754_v61 }
 0x269   :  { %v563_v40 = vmax.f32 %v527_v36, 0.0 }
 0x26a   :  { %v575_v41 = vpack.c.bf16 %v565_v38, %v564_v37 }
 0x26b   :  { %v574_v42 = vpack.c.bf16 %v563_v40, %v562_v39  ;;  %v2458_v43 = vpop.f32.mrb[12].mxu1  ;;  %2531 = vmatpush3.bf16.msra.mxu0 %v2754_v61 }
 0x26c   :  { %v548_v44 = vadd.f32 %v2458_v43, %v2180_v56  ;;  %v539_v45 = vpop.f32.mrb[13].mxu1 }
 0x26d   :  { %v540_v46 = vadd.f32 %v2180_v56, %v539_v45  ;;  %v2459_v47 = vpop.f32.mrb[14].mxu1  ;;  %2484 = vmatprep.mubr.bf16.mxu0 %v574_v42 }
 0x26e   :  { %v551_v48 = vadd.f32 %v2459_v47, %v2180_v56  ;;  %v542_v49 = vpop.f32.mrb[15].mxu1  ;;  %2485 = vmatmul.mubr.bf16.gmra.mrb[24].mxu0 %v575_v41  ;;  %v568_v51 = vmax.f32 %v548_v44, 0.0 }
 0x26f   :  { %v543_v50 = vadd.f32 %v2180_v56, %v542_v49  ;;  %v566_v53 = vmax.f32 %v540_v46, 0.0  ;;  %v2755_v56 = vld [vmem:[#allocation8 + $0x20] sm:$0xff]  }
 0x270   :  { %v569_v52 = vmax.f32 %v551_v48, 0.0  ;;  %2532 = vmatprep.subr.bf16.mxu0 %v2755_v56 }
 0x271   :  { %v567_v54 = vmax.f32 %v543_v50, 0.0  ;;  %2533 = vmatpush3.bf16.msra.mxu0 %v2755_v56 }
 0x272   :  { %v577_v55 = vpack.c.bf16 %v569_v52, %v568_v51  ;;  %2534 = vmatprep.subr.bf16.mxu0 %v2756_v62 }
 0x273   :  { %v576_v57 = vpack.c.bf16 %v567_v54, %v566_v53 }
 0x275   :  { %2488 = vmatprep.mubr.bf16.mxu0 %v576_v57  ;;  %2535 = vmatpush3.bf16.msra.mxu0 %v2756_v62 }
 0x276   :  { %2489 = vmatmul.mubr.bf16.gmra.mrb[28].mxu0 %v577_v55  ;;  %2536 = vmatprep.subr.bf16.mxu0 %v2757_v63 }
 0x279   :  { %2537 = vmatpush3.bf16.msra.mxu0 %v2757_v63 }
 0x331   :  { %v2478_v1 = vpop.f32.mrb[16].mxu0 }
 0x332   :  { %v692_v2 = vadd.f32 %v2478_v1, %v2189_v0  ;;  %v683_v3 = vpop.f32.mrb[17].mxu0 }
 0x333   :  { %v684_v5 = vadd.f32 %v2189_v0, %v683_v3  ;;  %v2479_v6 = vpop.f32.mrb[18].mxu0  ;;  %v2760_v3 = vld [vmem:[#allocation9 + $0x8] sm:$0xff]  }
 0x334   :  { %v695_v7 = vadd.f32 %v2479_v6, %v2189_v0  ;;  %v686_v8 = vpop.f32.mrb[19].mxu0  ;;  %v748_v10 = vmax.f32 %v692_v2, 0.0  ;;  %v2759_v2 = vld [vmem:[#allocation9] sm:$0xff]  }
 0x335   :  { %v687_v9 = vadd.f32 %v2189_v0, %v686_v8  ;;  %v746_v12 = vmax.f32 %v684_v5, 0.0 }
 0x336   :  { %v749_v11 = vmax.f32 %v695_v7, 0.0 }
 0x337   :  { %v747_v13 = vmax.f32 %v687_v9, 0.0 }
 0x338   :  { %v763_v16 = vpack.c.bf16 %v749_v11, %v748_v10 }
 0x339   :  { %v762_v17 = vpack.c.bf16 %v747_v13, %v746_v12  ;;  %v2482_v23 = vpop.f32.mrb[20].mxu0 }
 0x33a   :  { %v708_v24 = vadd.f32 %v2482_v23, %v2189_v0  ;;  %v699_v25 = vpop.f32.mrb[21].mxu0 }
 0x33b   :  { %v700_v26 = vadd.f32 %v2189_v0, %v699_v25  ;;  %v2483_v27 = vpop.f32.mrb[22].mxu0  ;;  %2492 = vmatprep.subr.bf16.mxu1 %v762_v17 }
 0x33c   :  { %v711_v28 = vadd.f32 %v2483_v27, %v2189_v0  ;;  %v702_v29 = vpop.f32.mrb[23].mxu0  ;;  %2493 = vmatpush3.bf16.msra.mxu1 %v762_v17  ;;  %v752_v31 = vmax.f32 %v708_v24, 0.0 }
 0x33d   :  { %v703_v30 = vadd.f32 %v2189_v0, %v702_v29  ;;  %2494 = vmatprep.subr.bf16.mxu1 %v763_v16  ;;  %v750_v33 = vmax.f32 %v700_v26, 0.0 }
 0x33e   :  { %v753_v32 = vmax.f32 %v711_v28, 0.0 }
 0x33f   :  { %v751_v34 = vmax.f32 %v703_v30, 0.0 }
 0x340   :  { %v765_v35 = vpack.c.bf16 %v753_v32, %v752_v31  ;;  %2495 = vmatpush3.bf16.msra.mxu1 %v763_v16 }
 0x341   :  { %v764_v36 = vpack.c.bf16 %v751_v34, %v750_v33  ;;  %v2486_v37 = vpop.f32.mrb[24].mxu0 }
 0x342   :  { %v724_v38 = vadd.f32 %v2486_v37, %v2189_v0  ;;  %v715_v39 = vpop.f32.mrb[25].mxu0  ;;  %v2766_v37 = vld [vmem:[#allocation9 + $0x38] sm:$0xff]  }
 0x343   :  { %v716_v40 = vadd.f32 %v2189_v0, %v715_v39  ;;  %v2487_v41 = vpop.f32.mrb[26].mxu0  ;;  %2496 = vmatprep.subr.bf16.mxu1 %v764_v36 }
 0x344   :  { %v727_v42 = vadd.f32 %v2487_v41, %v2189_v0  ;;  %v718_v43 = vpop.f32.mrb[27].mxu0  ;;  %2497 = vmatpush3.bf16.msra.mxu1 %v764_v36  ;;  %v756_v45 = vmax.f32 %v724_v38, 0.0  ;;  %v2765_v36 = vld [vmem:[#allocation9 + $0x30] sm:$0xff]   ;;  %v2198_v38 = vld [vmem:[%s3590_s8] ss:$0 sm:$0xff] }
 0x345   :  { %v719_v44 = vadd.f32 %v2189_v0, %v718_v43  ;;  %2498 = vmatprep.subr.bf16.mxu1 %v765_v35  ;;  %v754_v47 = vmax.f32 %v716_v40, 0.0 }
 0x346   :  { %v757_v46 = vmax.f32 %v727_v42, 0.0 }
 0x347   :  { %v755_v48 = vmax.f32 %v719_v44, 0.0 }
 0x348   :  { %v767_v49 = vpack.c.bf16 %v757_v46, %v756_v45  ;;  %2499 = vmatpush3.bf16.msra.mxu1 %v765_v35 }
 0x349   :  { %v766_v50 = vpack.c.bf16 %v755_v48, %v754_v47  ;;  %v2490_v51 = vpop.f32.mrb[28].mxu0 }
 0x34a   :  { %v740_v52 = vadd.f32 %v2490_v51, %v2189_v0  ;;  %v731_v53 = vpop.f32.mrb[29].mxu0 }
 0x34b   :  { %v732_v54 = vadd.f32 %v2189_v0, %v731_v53  ;;  %v2491_v55 = vpop.f32.mrb[30].mxu0  ;;  %2500 = vmatprep.subr.bf16.mxu1 %v766_v50 }
 0x34c   :  { %v743_v57 = vadd.f32 %v2491_v55, %v2189_v0  ;;  %v734_v58 = vpop.f32.mrb[31].mxu0  ;;  %2501 = vmatpush3.bf16.msra.mxu1 %v766_v50  ;;  %v760_v60 = vmax.f32 %v740_v52, 0.0 }
 0x34d   :  { %v735_v59 = vadd.f32 %v2189_v0, %v734_v58  ;;  %2502 = vmatprep.subr.bf16.mxu1 %v767_v49  ;;  %v758_v56 = vmax.f32 %v732_v54, 0.0  ;;  %v2758_v0 = vld [vmem:[#allocation8 + $0x38] sm:$0xff]  }
 0x34e   :  { %v761_v61 = vmax.f32 %v743_v57, 0.0  ;;  %2538 = vmatprep.subr.bf16.mxu0 %v2758_v0 }
 0x34f   :  { %v759_v62 = vmax.f32 %v735_v59, 0.0  ;;  %2539 = vmatpush3.bf16.msra.mxu0 %v2758_v0 }
 0x350   :  { %v769_v63 = vpack.c.bf16 %v761_v61, %v760_v60  ;;  %2503 = vmatpush3.bf16.msra.mxu1 %v767_v49 }
 0x351   :  { %v768_v1 = vpack.c.bf16 %v759_v62, %v758_v56 }
 0x353   :  { %2504 = vmatprep.subr.bf16.mxu1 %v768_v1 }
 0x354   :  { %2505 = vmatpush3.bf16.msra.mxu1 %v768_v1 }
 0x355   :  { %2506 = vmatprep.subr.bf16.mxu1 %v769_v63 }
 0x358   :  { %2507 = vmatpush3.bf16.msra.mxu1 %v769_v63 }
 0x359   :  { %2556 = vmatprep.subr.bf16.mxu1 %v2759_v2 }
 0x35b   :  { %2509 = vmatmul.mubr.bf16.vlgmr.msra.gmra.mrb[16].mxu1 %v3243_v14  ;;  %v2761_v14 = vld [vmem:[#allocation9 + $0x10] sm:$0xff]  }
 0x35c   :  { %2512 = vmatprep.mubr.bf16.mxu1 %v3248_v15  ;;  %2557 = vmatpush3.bf16.msra.mxu1 %v2759_v2  ;;  %v2762_v15 = vld [vmem:[#allocation9 + $0x18] sm:$0xff]  }
 0x35d   :  { %2558 = vmatprep.subr.bf16.mxu1 %v2760_v3 }
 0x360   :  { %2559 = vmatpush3.bf16.msra.mxu1 %v2760_v3 }
 0x361   :  { %2560 = vmatprep.subr.bf16.mxu1 %v2761_v14 }
 0x363   :  { %2513 = vmatmul.mubr.bf16.gmra.mrb[20].mxu1 %v3255_v18  ;;  %v2763_v18 = vld [vmem:[#allocation9 + $0x20] sm:$0xff]  }
 0x364   :  { %2516 = vmatprep.mubr.bf16.mxu1 %v3260_v19  ;;  %2561 = vmatpush3.bf16.msra.mxu1 %v2761_v14  ;;  %v2764_v19 = vld [vmem:[#allocation9 + $0x28] sm:$0xff]  }
 0x365   :  { %2562 = vmatprep.subr.bf16.mxu1 %v2762_v15 }
 0x368   :  { %2563 = vmatpush3.bf16.msra.mxu1 %v2762_v15 }
 0x369   :  { %2564 = vmatprep.subr.bf16.mxu1 %v2763_v18 }
 0x36b   :  { %2517 = vmatmul.mubr.bf16.gmra.mrb[24].mxu1 %v3267_v20 }
 0x36c   :  { %2520 = vmatprep.mubr.bf16.mxu1 %v3272_v21  ;;  %2565 = vmatpush3.bf16.msra.mxu1 %v2763_v18 }
 0x36d   :  { %2566 = vmatprep.subr.bf16.mxu1 %v2764_v19 }
 0x370   :  { %2567 = vmatpush3.bf16.msra.mxu1 %v2764_v19 }
 0x371   :  { %2568 = vmatprep.subr.bf16.mxu1 %v2765_v36 }
 0x373   :  { %2521 = vmatmul.mubr.bf16.gmra.mrb[28].mxu1 %v3279_v22 }
 0x374   :  { %2569 = vmatpush3.bf16.msra.mxu1 %v2765_v36  ;;  %v2769_v36 = vld [vmem:[#allocation11 + $0x10] sm:$0xff]  }
 0x375   :  { %2570 = vmatprep.subr.bf16.mxu1 %v2766_v37 }
 0x378   :  { %2571 = vmatpush3.bf16.msra.mxu1 %v2766_v37  ;;  %v2770_v37 = vld [vmem:[#allocation11 + $0x18] sm:$0xff]  }
 0x42e   :  { %v2510_v5 = vpop.f32.mrb[16].mxu1 }
 0x42f   :  { %v804_v6 = vpop.f32.mrb[17].mxu1 }
 0x430   :  { %v2511_v7 = vpop.f32.mrb[18].mxu1 }
 0x431   :  { %v868_v8 = vpack.c.bf16 %v2511_v7, %v2510_v5  ;;  %v807_v9 = vpop.f32.mrb[19].mxu1 }
 0x432   :  { %v867_v10 = vpack.c.bf16 %v807_v9, %v804_v6 }
 0x434   :  { %2540 = vmatprep.mubr.bf16.mxu0 %v867_v10 }
 0x435   :  { %2541 = vmatmul.mubr.bf16.vlgmr.msra.gmra.mrb[32].mxu0 %v868_v8 }
 0x436   :  { %v2514_v11 = vpop.f32.mrb[20].mxu1 }
 0x437   :  { %v820_v12 = vpop.f32.mrb[21].mxu1 }
 0x438   :  { %v2515_v13 = vpop.f32.mrb[22].mxu1 }
 0x439   :  { %v870_v16 = vpack.c.bf16 %v2515_v13, %v2514_v11  ;;  %v823_v17 = vpop.f32.mrb[23].mxu1 }
 0x43a   :  { %v869_v23 = vpack.c.bf16 %v823_v17, %v820_v12 }
 0x43c   :  { %2544 = vmatprep.mubr.bf16.mxu0 %v869_v23 }
 0x43d   :  { %2545 = vmatmul.mubr.bf16.gmra.mrb[36].mxu0 %v870_v16 }
 0x43e   :  { %v2518_v24 = vpop.f32.mrb[24].mxu1 }
 0x43f   :  { %v836_v25 = vpop.f32.mrb[25].mxu1 }
 0x440   :  { %v2519_v26 = vpop.f32.mrb[26].mxu1 }
 0x441   :  { %v872_v27 = vpack.c.bf16 %v2519_v26, %v2518_v24  ;;  %v839_v28 = vpop.f32.mrb[27].mxu1 }
 0x442   :  { %v871_v29 = vpack.c.bf16 %v839_v28, %v836_v25 }
 0x444   :  { %2548 = vmatprep.mubr.bf16.mxu0 %v871_v29 }
 0x445   :  { %2549 = vmatmul.mubr.bf16.gmra.mrb[40].mxu0 %v872_v27 }
 0x446   :  { %v2522_v30 = vpop.f32.mrb[28].mxu1 }
 0x447   :  { %v852_v31 = vpop.f32.mrb[29].mxu1 }
 0x448   :  { %v2523_v32 = vpop.f32.mrb[30].mxu1 }
 0x449   :  { %v874_v33 = vpack.c.bf16 %v2523_v32, %v2522_v30  ;;  %v855_v34 = vpop.f32.mrb[31].mxu1 }
 0x44a   :  { %v873_v35 = vpack.c.bf16 %v855_v34, %v852_v31  ;;  %v2767_v34 = vld [vmem:[#allocation11] sm:$0xff]  }
 0x44b   :  { %2620 = vmatprep.subr.bf16.mxu1 %v2767_v34 }
 0x44c   :  { %2552 = vmatprep.mubr.bf16.mxu0 %v873_v35  ;;  %v2768_v35 = vld [vmem:[#allocation11 + $0x8] sm:$0xff]  }
 0x44d   :  { %2553 = vmatmul.mubr.bf16.gmra.mrb[44].mxu0 %v874_v33 }
 0x44e   :  { %2604 = vmatprep.mubr.bf16.mxu0 %v3225_v4 }
 0x508   :  { %v2542_v39 = vpop.f32.mrb[32].mxu0 }
 0x509   :  { %v989_v40 = vadd.f32 %v2542_v39, %v2198_v38  ;;  %v980_v41 = vpop.f32.mrb[33].mxu0  ;;  %v2772_v39 = vld [vmem:[#allocation11 + $0x28] sm:$0xff]  }
 0x50a   :  { %v981_v42 = vadd.f32 %v2198_v38, %v980_v41  ;;  %v2543_v43 = vpop.f32.mrb[34].mxu0  ;;  %v2207_v41 = vld [vmem:[%s3592_s10] ss:$0 sm:$0xff] }
 0x50b   :  { %v992_v44 = vadd.f32 %v2543_v43, %v2198_v38  ;;  %v983_v45 = vpop.f32.mrb[35].mxu0  ;;  %v1045_v47 = vmax.f32 %v989_v40, 0.0  ;;  %v2773_v40 = vld [vmem:[#allocation11 + $0x30] sm:$0xff]  }
 0x50c   :  { %v984_v46 = vadd.f32 %v2198_v38, %v983_v45  ;;  %v1043_v48 = vmax.f32 %v981_v42, 0.0 }
 0x50d   :  { %v1046_v4 = vmax.f32 %v992_v44, 0.0 }
 0x50e   :  { %v1044_v49 = vmax.f32 %v984_v46, 0.0 }
 0x50f   :  { %v1060_v50 = vpack.c.bf16 %v1046_v4, %v1045_v47 }
 0x510   :  { %v1059_v51 = vpack.c.bf16 %v1044_v49, %v1043_v48  ;;  %v2546_v52 = vpop.f32.mrb[36].mxu0 }
 0x511   :  { %v1005_v53 = vadd.f32 %v2546_v52, %v2198_v38  ;;  %v996_v54 = vpop.f32.mrb[37].mxu0 }
 0x512   :  { %v997_v55 = vadd.f32 %v2198_v38, %v996_v54  ;;  %v2547_v57 = vpop.f32.mrb[38].mxu0  ;;  %2572 = vmatprep.mubr.bf16.mxu1 %v1059_v51 }
 0x513   :  { %v1008_v58 = vadd.f32 %v2547_v57, %v2198_v38  ;;  %v999_v59 = vpop.f32.mrb[39].mxu0  ;;  %2573 = vmatmul.mubr.bf16.vlgmr.msra.gmra.mrb[32].mxu1 %v1060_v50  ;;  %v1049_v61 = vmax.f32 %v1005_v53, 0.0 }
 0x514   :  { %v1000_v60 = vadd.f32 %v2198_v38, %v999_v59  ;;  %v1047_v62 = vmax.f32 %v997_v55, 0.0  ;;  %2621 = vmatpush3.bf16.msra.mxu1 %v2767_v34 }
 0x515   :  { %v1050_v56 = vmax.f32 %v1008_v58, 0.0  ;;  %2622 = vmatprep.subr.bf16.mxu1 %v2768_v35 }
 0x516   :  { %v1048_v63 = vmax.f32 %v1000_v60, 0.0 }
 0x517   :  { %v1062_v1 = vpack.c.bf16 %v1050_v56, %v1049_v61 }
 0x518   :  { %v1061_v0 = vpack.c.bf16 %v1048_v63, %v1047_v62  ;;  %v2550_v2 = vpop.f32.mrb[40].mxu0  ;;  %2623 = vmatpush3.bf16.msra.mxu1 %v2768_v35 }
 0x519   :  { %v1021_v3 = vadd.f32 %v2550_v2, %v2198_v38  ;;  %v1012_v14 = vpop.f32.mrb[41].mxu0  ;;  %2624 = vmatprep.subr.bf16.mxu1 %v2769_v36 }
 0x51a   :  { %v1013_v15 = vadd.f32 %v2198_v38, %v1012_v14  ;;  %v2551_v18 = vpop.f32.mrb[42].mxu0  ;;  %2576 = vmatprep.mubr.bf16.mxu1 %v1061_v0 }
 0x51b   :  { %v1024_v19 = vadd.f32 %v2551_v18, %v2198_v38  ;;  %v1015_v5 = vpop.f32.mrb[43].mxu0  ;;  %2577 = vmatmul.mubr.bf16.gmra.mrb[36].mxu1 %v1062_v1  ;;  %v1053_v7 = vmax.f32 %v1021_v3, 0.0 }
 0x51c   :  { %v1016_v6 = vadd.f32 %v2198_v38, %v1015_v5  ;;  %v1051_v9 = vmax.f32 %v1013_v15, 0.0  ;;  %2625 = vmatpush3.bf16.msra.mxu1 %v2769_v36 }
 0x51d   :  { %v1054_v8 = vmax.f32 %v1024_v19, 0.0  ;;  %2626 = vmatprep.subr.bf16.mxu1 %v2770_v37 }
 0x51e   :  { %v1052_v10 = vmax.f32 %v1016_v6, 0.0 }
 0x51f   :  { %v1064_v11 = vpack.c.bf16 %v1054_v8, %v1053_v7 }
 0x520   :  { %v1063_v12 = vpack.c.bf16 %v1052_v10, %v1051_v9  ;;  %v2554_v13 = vpop.f32.mrb[44].mxu0  ;;  %2627 = vmatpush3.bf16.msra.mxu1 %v2770_v37  ;;  %v2791_v37 = vld [vmem:[%s3605_s28 + $0x8] sm:$0xff]  }
 0x521   :  { %v1037_v16 = vadd.f32 %v2554_v13, %v2198_v38  ;;  %v1028_v17 = vpop.f32.mrb[45].mxu0 }
 0x522   :  { %v1029_v23 = vadd.f32 %v2198_v38, %v1028_v17  ;;  %v2555_v24 = vpop.f32.mrb[46].mxu0  ;;  %2580 = vmatprep.mubr.bf16.mxu1 %v1063_v12 }
 0x523   :  { %v1040_v25 = vadd.f32 %v2555_v24, %v2198_v38  ;;  %v1031_v26 = vpop.f32.mrb[47].mxu0  ;;  %2581 = vmatmul.mubr.bf16.gmra.mrb[40].mxu1 %v1064_v11  ;;  %v1057_v28 = vmax.f32 %v1037_v16, 0.0 }
 0x524   :  { %v1032_v27 = vadd.f32 %v2198_v38, %v1031_v26  ;;  %v1055_v30 = vmax.f32 %v1029_v23, 0.0  ;;  %v2771_v38 = vld [vmem:[#allocation11 + $0x20] sm:$0xff]  }
 0x525   :  { %v1058_v29 = vmax.f32 %v1040_v25, 0.0  ;;  %2628 = vmatprep.subr.bf16.mxu1 %v2771_v38 }
 0x526   :  { %v1056_v31 = vmax.f32 %v1032_v27, 0.0  ;;  %2629 = vmatpush3.bf16.msra.mxu1 %v2771_v38  ;;  %v2792_v38 = vld [vmem:[%s3605_s28 + $0x10] sm:$0xff]  }
 0x527   :  { %v1066_v32 = vpack.c.bf16 %v1058_v29, %v1057_v28  ;;  %2630 = vmatprep.subr.bf16.mxu1 %v2772_v39 }
 0x528   :  { %v1065_v33 = vpack.c.bf16 %v1056_v31, %v1055_v30 }
 0x52a   :  { %2584 = vmatprep.mubr.bf16.mxu1 %v1065_v33  ;;  %2631 = vmatpush3.bf16.msra.mxu1 %v2772_v39  ;;  %v2793_v39 = vld [vmem:[%s3605_s28 + $0x18] sm:$0xff]  }
 0x52b   :  { %2585 = vmatmul.mubr.bf16.gmra.mrb[44].mxu1 %v1066_v32  ;;  %2632 = vmatprep.subr.bf16.mxu1 %v2773_v40 }
 0x52e   :  { %2633 = vmatpush3.bf16.msra.mxu1 %v2773_v40  ;;  %v2794_v40 = vld [vmem:[%s3605_s28 + $0x20] sm:$0xff]  }
 0x5e6   :  { %v2574_v42 = vpop.f32.mrb[32].mxu1 }
 0x5e7   :  { %v1181_v43 = vadd.f32 %v2574_v42, %v2207_v41  ;;  %v1172_v44 = vpop.f32.mrb[33].mxu1  ;;  %v2775_v42 = vld [vmem:[#allocation12] sm:$0xff]  }
 0x5e8   :  { %v1173_v45 = vadd.f32 %v2207_v41, %v1172_v44  ;;  %v2575_v46 = vpop.f32.mrb[34].mxu1  ;;  %v2777_v44 = vld [vmem:[#allocation12 + $0x10] sm:$0xff]  }
 0x5e9   :  { %v1184_v47 = vadd.f32 %v2575_v46, %v2207_v41  ;;  %v1175_v4 = vpop.f32.mrb[35].mxu1  ;;  %v1237_v49 = vmax.f32 %v1181_v43, 0.0  ;;  %v2776_v43 = vld [vmem:[#allocation12 + $0x8] sm:$0xff]   ;;  %v2779_v46 = vld [vmem:[#allocation12 + $0x20] sm:$0xff]  }
 0x5ea   :  { %v1176_v48 = vadd.f32 %v2207_v41, %v1175_v4  ;;  %v1235_v51 = vmax.f32 %v1173_v45, 0.0  ;;  %v2778_v45 = vld [vmem:[#allocation12 + $0x18] sm:$0xff]  }
 0x5eb   :  { %v1238_v50 = vmax.f32 %v1184_v47, 0.0 }
 0x5ec   :  { %v1236_v52 = vmax.f32 %v1176_v48, 0.0 }
 0x5ed   :  { %v1252_v53 = vpack.c.bf16 %v1238_v50, %v1237_v49 }
 0x5ee   :  { %v1251_v54 = vpack.c.bf16 %v1236_v52, %v1235_v51  ;;  %v2578_v55 = vpop.f32.mrb[36].mxu1 }
 0x5ef   :  { %v1197_v57 = vadd.f32 %v2578_v55, %v2207_v41  ;;  %v1188_v58 = vpop.f32.mrb[37].mxu1 }
 0x5f0   :  { %v1189_v59 = vadd.f32 %v2207_v41, %v1188_v58  ;;  %v2579_v60 = vpop.f32.mrb[38].mxu1  ;;  %2588 = vmatprep.subr.bf16.mxu0 %v1251_v54 }
 0x5f1   :  { %v1200_v61 = vadd.f32 %v2579_v60, %v2207_v41  ;;  %v1191_v56 = vpop.f32.mrb[39].mxu1  ;;  %2589 = vmatpush3.bf16.msra.mxu0 %v1251_v54  ;;  %v1241_v63 = vmax.f32 %v1197_v57, 0.0 }
 0x5f2   :  { %v1192_v62 = vadd.f32 %v2207_v41, %v1191_v56  ;;  %2590 = vmatprep.subr.bf16.mxu0 %v1252_v53  ;;  %v1239_v0 = vmax.f32 %v1189_v59, 0.0 }
 0x5f3   :  { %v1242_v1 = vmax.f32 %v1200_v61, 0.0 }
 0x5f4   :  { %v1240_v2 = vmax.f32 %v1192_v62, 0.0 }
 0x5f5   :  { %v1254_v3 = vpack.c.bf16 %v1242_v1, %v1241_v63  ;;  %2591 = vmatpush3.bf16.msra.mxu0 %v1252_v53 }
 0x5f6   :  { %v1253_v14 = vpack.c.bf16 %v1240_v2, %v1239_v0  ;;  %v2582_v15 = vpop.f32.mrb[40].mxu1 }
 0x5f7   :  { %v1213_v18 = vadd.f32 %v2582_v15, %v2207_v41  ;;  %v1204_v19 = vpop.f32.mrb[41].mxu1  ;;  %v1750_v15 = vld [vmem:[%s3584_s2 + $0x10] sm:$0xff] }
 0x5f8   :  { %v1205_v5 = vadd.f32 %v2207_v41, %v1204_v19  ;;  %v2583_v6 = vpop.f32.mrb[42].mxu1  ;;  %2592 = vmatprep.subr.bf16.mxu0 %v1253_v14  ;;  %v2782_v19 = vld [vmem:[#allocation12 + $0x38] sm:$0xff]   ;;  %vm1766_vm0 = vcmp.eq.s32.totalorder %v1750_v15, 0  ;;  %vm1900_vm11 = vcmp.eq.s32.totalorder %v1750_v15, 1 }
 0x5f9   :  { %v1216_v7 = vadd.f32 %v2583_v6, %v2207_v41  ;;  %v1207_v8 = vpop.f32.mrb[43].mxu1  ;;  %2593 = vmatpush3.bf16.msra.mxu0 %v1253_v14  ;;  %v1245_v10 = vmax.f32 %v1213_v18, 0.0  ;;  %v2781_v14 = vld [vmem:[#allocation12 + $0x30] sm:$0xff]   ;;  %v1748_v18 = vld [vmem:[%s3584_s2] sm:$0xff] }
 0x5fa   :  { %v1208_v9 = vadd.f32 %v2207_v41, %v1207_v8  ;;  %2594 = vmatprep.subr.bf16.mxu0 %v1254_v3  ;;  %v1243_v12 = vmax.f32 %v1205_v5, 0.0  ;;  %vm1764_vm1 = vcmp.eq.s32.totalorder %v1748_v18, 0  ;;  %v2990_v5 = vmov 0   ;;  %v1751_v8 = vld [vmem:[%s3584_s2 + $0x18] sm:$0xff] }
 0x5fb   :  { %v1246_v11 = vmax.f32 %v1216_v7, 0.0  ;;  %2718 = vset.pattern.permute.xlu1 %v2990_v5  ;;  %2717 = vset.pattern.permute.xlu0 %v2990_v5  ;;  %v1782_v6 = vsel %vm1766_vm0, 1, %v2990_v5  ;;  %v1780_v7 = vsel %vm1764_vm1, 1, %v2990_v5  ;;  %vm1767_vm2 = vcmp.eq.s32.totalorder %v1751_v8, 0 }
 0x5fc   :  { %v1244_v13 = vmax.f32 %v1208_v9, 0.0  ;;  %1803 = vperm.xlu1 %2718, %v1782_v6   ;;  %1797 = vperm.xlu0 %2717, %v1780_v7   ;;  %v1749_v9 = vld [vmem:[%s3584_s2 + $0x8] sm:$0xff]  ;;  %vm1898_vm9 = vcmp.eq.s32.totalorder %v1748_v18, 1  ;;  %vm1901_vm10 = vcmp.eq.s32.totalorder %v1751_v8, 1 }
 0x5fd   :  { %v1256_v16 = vpack.c.bf16 %v1246_v11, %v1245_v10  ;;  %2595 = vmatpush3.bf16.msra.mxu0 %v1254_v3  ;;  %vm1765_vm3 = vcmp.eq.s32.totalorder %v1749_v9, 0  ;;  %v1783_v10 = vsel %vm1767_vm2, 1, %v2990_v5  ;;  %vm1899_vm8 = vcmp.eq.s32.totalorder %v1749_v9, 1 }
 0x5fe   :  { %v1255_v17 = vpack.c.bf16 %v1244_v13, %v1243_v12  ;;  %v2586_v23 = vpop.f32.mrb[44].mxu1  ;;  %v1781_v11 = vsel %vm1765_vm3, 1, %v2990_v5  ;;  %v1753_v12 = vld [vmem:[%s3584_s2 + $0x28] sm:$0xff]  ;;  %v1752_v13 = vld [vmem:[%s3584_s2 + $0x20] sm:$0xff] }
 0x5ff   :  { %v1229_v24 = vadd.f32 %v2586_v23, %v2207_v41  ;;  %v1220_v25 = vpop.f32.mrb[45].mxu1  ;;  %vm1769_vm4 = vcmp.eq.s32.totalorder %v1753_v12, 0  ;;  %vm1768_vm5 = vcmp.eq.s32.totalorder %v1752_v13, 0  ;;  %v1755_v23 = vld [vmem:[%s3584_s2 + $0x38] sm:$0xff]  ;;  %vm1903_vm12 = vcmp.eq.s32.totalorder %v1753_v12, 1 }
 0x600   :  { %v1221_v26 = vadd.f32 %v2207_v41, %v1220_v25  ;;  %v2587_v27 = vpop.f32.mrb[46].mxu1  ;;  %2596 = vmatprep.subr.bf16.mxu0 %v1255_v17  ;;  %1806 = vperm.xlu1 %2718, %v1783_v10   ;;  %vm1771_vm6 = vcmp.eq.s32.totalorder %v1755_v23, 0  ;;  %vm1902_vm13 = vcmp.eq.s32.totalorder %v1752_v13, 1  ;;  %vm1905_vm14 = vcmp.eq.s32.totalorder %v1755_v23, 1 }
 0x601   :  { %v1232_v28 = vadd.f32 %v2587_v27, %v2207_v41  ;;  %v1223_v29 = vpop.f32.mrb[47].mxu1  ;;  %2597 = vmatpush3.bf16.msra.mxu0 %v1255_v17  ;;  %v1249_v31 = vmax.f32 %v1229_v24, 0.0  ;;  %1800 = vperm.xlu0 %2717, %v1781_v11   ;;  %v1784_v17 = vsel %vm1768_vm5, 1, %v2990_v5  ;;  %v1754_v24 = vld [vmem:[%s3584_s2 + $0x30] sm:$0xff]  ;;  %v1787_v25 = vsel %vm1771_vm6, 1, %v2990_v5 }
 0x602   :  { %v1224_v30 = vadd.f32 %v2207_v41, %v1223_v29  ;;  %2598 = vmatprep.subr.bf16.mxu0 %v1256_v16  ;;  %v1247_v33 = vmax.f32 %v1221_v26, 0.0  ;;  %v2774_v41 = vld [vmem:[#allocation11 + $0x38] sm:$0xff]   ;;  %vm1770_vm7 = vcmp.eq.s32.totalorder %v1754_v24, 0  ;;  %v1915_v27 = vsel %vm1899_vm8, 1, %v2990_v5 }
 0x603   :  { %v1250_v32 = vmax.f32 %v1232_v28, 0.0  ;;  %2634 = vmatprep.subr.bf16.mxu1 %v2774_v41  ;;  %v1786_v26 = vsel %vm1770_vm7, 1, %v2990_v5  ;;  %v1914_v28 = vsel %vm1898_vm9, 1, %v2990_v5  ;;  %v1917_v29 = vsel %vm1901_vm10, 1, %v2990_v5 }
 0x604   :  { %v1248_v34 = vmax.f32 %v1224_v30, 0.0  ;;  %2635 = vmatpush3.bf16.msra.mxu1 %v2774_v41  ;;  %v1916_v30 = vsel %vm1900_vm11, 1, %v2990_v5  ;;  %vm1904_vm15 = vcmp.eq.s32.totalorder %v1754_v24, 1 }
 0x605   :  { %v1258_v35 = vpack.c.bf16 %v1250_v32, %v1249_v31  ;;  %2599 = vmatpush3.bf16.msra.mxu0 %v1256_v16  ;;  %v1785_v16 = vsel %vm1769_vm4, 1, %v2990_v5  ;;  %1809 = vperm.xlu0 %2717, %v1784_v17   ;;  %v1919_v31 = vsel %vm1903_vm12, 1, %v2990_v5  ;;  %v1918_v32 = vsel %vm1902_vm13, 1, %v2990_v5 }
 0x606   :  { %v1257_v36 = vpack.c.bf16 %v1248_v34, %v1247_v33  ;;  %1812 = vperm.xlu1 %2718, %v1785_v16   ;;  %v1921_v33 = vsel %vm1905_vm14, 1, %v2990_v5  ;;  %v1920_v34 = vsel %vm1904_vm15, 1, %v2990_v5 }
 0x608   :  { %2600 = vmatprep.subr.bf16.mxu0 %v1257_v36 }
 0x609   :  { %2601 = vmatpush3.bf16.msra.mxu0 %v1257_v36  ;;  %1815 = vperm.xlu0 %2717, %v1786_v26   ;;  %v1756_v36 = vld [vmem:[%s3584_s2 + $0x40] sm:$0xff] }
 0x60a   :  { %2602 = vmatprep.subr.bf16.mxu0 %v1258_v35  ;;  %1818 = vperm.xlu1 %2718, %v1787_v25   ;;  %vm1772_vm1 = vcmp.eq.s32.totalorder %v1756_v36, 0  ;;  %vm1906_vm5 = vcmp.eq.s32.totalorder %v1756_v36, 1 }
 0x60d   :  { %2603 = vmatpush3.bf16.msra.mxu0 %v1258_v35  ;;  %1931 = vperm.xlu0 %2717, %v1914_v28   ;;  %v1757_v35 = vld [vmem:[%s3584_s2 + $0x48] sm:$0xff] }
 0x60e   :  { %2652 = vmatprep.subr.bf16.mxu0 %v2775_v42  ;;  %1934 = vperm.xlu1 %2718, %v1915_v27   ;;  %vm1773_vm0 = vcmp.eq.s32.totalorder %v1757_v35, 0  ;;  %vm1907_vm4 = vcmp.eq.s32.totalorder %v1757_v35, 1 }
 0x610   :  { %2605 = vmatmul.mubr.bf16.vlgmr.msra.gmra.mrb[48].mxu0 %v2791_v37  ;;  %v1759_v37 = vld [vmem:[%s3584_s2 + $0x58] sm:$0xff] }
 0x611   :  { %2608 = vmatprep.mubr.bf16.mxu0 %v2792_v38  ;;  %2653 = vmatpush3.bf16.msra.mxu0 %v2775_v42  ;;  %v1758_v38 = vld [vmem:[%s3584_s2 + $0x50] sm:$0xff]  ;;  %vm1775_vm2 = vcmp.eq.s32.totalorder %v1759_v37, 0  ;;  %vm1909_vm6 = vcmp.eq.s32.totalorder %v1759_v37, 1 }
 0x612   :  { %2654 = vmatprep.subr.bf16.mxu0 %v2776_v43  ;;  %1940 = vperm.xlu1 %2718, %v1917_v29   ;;  %vm1774_vm3 = vcmp.eq.s32.totalorder %v1758_v38, 0  ;;  %v1791_v41 = vsel %vm1775_vm2, 1, %v2990_v5  ;;  %vm1908_vm7 = vcmp.eq.s32.totalorder %v1758_v38, 1 }
 0x613   :  { %1937 = vperm.xlu0 %2717, %v1916_v30   ;;  %v1790_v42 = vsel %vm1774_vm3, 1, %v2990_v5 }
 0x615   :  { %2655 = vmatpush3.bf16.msra.mxu0 %v2776_v43  ;;  %v1923_v43 = vsel %vm1907_vm4, 1, %v2990_v5 }
 0x616   :  { %2656 = vmatprep.subr.bf16.mxu0 %v2777_v44  ;;  %1946 = vperm.xlu1 %2718, %v1919_v31  }
 0x617   :  { %1943 = vperm.xlu0 %2717, %v1918_v32  }
 0x618   :  { %2609 = vmatmul.mubr.bf16.gmra.mrb[52].mxu0 %v2793_v39  ;;  %v1789_v39 = vsel %vm1773_vm0, 1, %v2990_v5  ;;  %vm2992_vm0 = vmmov 0  }
 0x619   :  { %2612 = vmatprep.mubr.bf16.mxu0 %v2794_v40  ;;  %2657 = vmatpush3.bf16.msra.mxu0 %v2777_v44  ;;  %v1788_v40 = vsel %vm1772_vm1, 1, %v2990_v5  ;;  %v1922_v44 = vsel %vm1906_vm5, 1, %v2990_v5 }
 0x61a   :  { %2658 = vmatprep.subr.bf16.mxu0 %v2778_v45  ;;  %1952 = vperm.xlu1 %2718, %v1921_v33  }
 0x61b   :  { %1949 = vperm.xlu0 %2717, %v1920_v34  }
 0x61d   :  { %2659 = vmatpush3.bf16.msra.mxu0 %v2778_v45  ;;  %v1761_v45 = vld [vmem:[%s3584_s2 + $0x68] sm:$0xff] }
 0x61e   :  { %2660 = vmatprep.subr.bf16.mxu0 %v2779_v46  ;;  %1824 = vperm.xlu1 %2718, %v1789_v39   ;;  %vm1777_vm8 = vcmp.eq.s32.totalorder %v1761_v45, 0  ;;  %vm1911_vm12 = vcmp.eq.s32.totalorder %v1761_v45, 1 }
 0x61f   :  { %1821 = vperm.xlu0 %2717, %v1788_v40  }
 0x620   :  { %2613 = vmatmul.mubr.bf16.gmra.mrb[56].mxu0 %v3267_v20  ;;  %v2780_v20 = vld [vmem:[#allocation12 + $0x28] sm:$0xff]  }
 0x621   :  { %2616 = vmatprep.mubr.bf16.mxu0 %v3272_v21  ;;  %2661 = vmatpush3.bf16.msra.mxu0 %v2779_v46  ;;  %v1760_v46 = vld [vmem:[%s3584_s2 + $0x60] sm:$0xff] }
 0x622   :  { %2662 = vmatprep.subr.bf16.mxu0 %v2780_v20  ;;  %1830 = vperm.xlu1 %2718, %v1791_v41   ;;  %vm1776_vm9 = vcmp.eq.s32.totalorder %v1760_v46, 0  ;;  %vm1910_vm13 = vcmp.eq.s32.totalorder %v1760_v46, 1 }
 0x623   :  { %1827 = vperm.xlu0 %2717, %v1790_v42  }
 0x625   :  { %2663 = vmatpush3.bf16.msra.mxu0 %v2780_v20  ;;  %v1925_v20 = vsel %vm1909_vm6, 1, %v2990_v5 }
 0x626   :  { %2664 = vmatprep.subr.bf16.mxu0 %v2781_v14  ;;  %1958 = vperm.xlu1 %2718, %v1923_v43  }
 0x627   :  { %1955 = vperm.xlu0 %2717, %v1922_v44  }
 0x628   :  { %2617 = vmatmul.mubr.bf16.gmra.mrb[60].mxu0 %v3279_v22 }
 0x629   :  { %2665 = vmatpush3.bf16.msra.mxu0 %v2781_v14 }
 0x62a   :  { %2666 = vmatprep.subr.bf16.mxu0 %v2782_v19  ;;  %1964 = vperm.xlu1 %2718, %v1925_v20  }
 0x62d   :  { %2667 = vmatpush3.bf16.msra.mxu0 %v2782_v19 }
 0x6e3   :  { %v2606_v21 = vpop.f32.mrb[48].mxu0 }
 0x6e4   :  { %v1293_v22 = vpop.f32.mrb[49].mxu0 }
 0x6e5   :  { %v2607_v47 = vpop.f32.mrb[50].mxu0 }
 0x6e6   :  { %v1357_v4 = vpack.c.bf16 %v2607_v47, %v2606_v21  ;;  %v1296_v48 = vpop.f32.mrb[51].mxu0  ;;  %v1924_v21 = vsel %vm1908_vm7, 1, %v2990_v5  ;;  %v1762_v47 = vld [vmem:[%s3584_s2 + $0x70] sm:$0xff] }
 0x6e7   :  { %v1356_v49 = vpack.c.bf16 %v1296_v48, %v1293_v22  ;;  %v1763_v22 = vld [vmem:[%s3584_s2 + $0x78] sm:$0xff]  ;;  %1961 = vperm.xlu0 %2717, %v1924_v21   ;;  %v1792_v48 = vsel %vm1776_vm9, 1, %v2990_v5  ;;  %vm1778_vm11 = vcmp.eq.s32.totalorder %v1762_v47, 0  ;;  %vm1912_vm15 = vcmp.eq.s32.totalorder %v1762_v47, 1 }
 0x6e8   :  { %vm1779_vm10 = vcmp.eq.s32.totalorder %v1763_v22, 0  ;;  %vm1913_vm14 = vcmp.eq.s32.totalorder %v1763_v22, 1 }
 0x6e9   :  { %2636 = vmatprep.mubr.bf16.mxu1 %v1356_v49  ;;  %v1795_v49 = vsel %vm1779_vm10, 1, %v2990_v5 }
 0x6ea   :  { %2637 = vmatmul.mubr.bf16.vlgmr.msra.gmra.mrb[48].mxu1 %v1357_v4  ;;  %v1793_v4 = vsel %vm1777_vm8, 1, %v2990_v5 }
 0x6eb   :  { %v2610_v50 = vpop.f32.mrb[52].mxu0  ;;  %1836 = vperm.xlu1 %2718, %v1793_v4   ;;  %1833 = vperm.xlu0 %2717, %v1792_v48   ;;  %v2783_v48 = vld [vmem:[#allocation14] sm:$0xff]  }
 0x6ec   :  { %v1309_v51 = vpop.f32.mrb[53].mxu0 }
 0x6ed   :  { %v2611_v52 = vpop.f32.mrb[54].mxu0 }
 0x6ee   :  { %v1359_v53 = vpack.c.bf16 %v2611_v52, %v2610_v50  ;;  %v1312_v54 = vpop.f32.mrb[55].mxu0  ;;  %v1794_v50 = vsel %vm1778_vm11, 1, %v2990_v5  ;;  %v1926_v52 = vsel %vm1910_vm13, 1, %v2990_v5 }
 0x6ef   :  { %v1358_v55 = vpack.c.bf16 %v1312_v54, %v1309_v51  ;;  %1842 = vperm.xlu1 %2718, %v1795_v49   ;;  %1839 = vperm.xlu0 %2717, %v1794_v50   ;;  %v1927_v51 = vsel %vm1911_vm12, 1, %v2990_v5  ;;  %v1928_v54 = vsel %vm1912_vm15, 1, %v2990_v5  ;;  %v2991_v49 = vmov 0.0   ;;  %v2784_v50 = vld [vmem:[#allocation14 + $0x8] sm:$0xff]  }
 0x6f0   :  { %2684 = vmatprep.subr.bf16.mxu1 %v2991_v49 }
 0x6f1   :  { %2640 = vmatprep.mubr.bf16.mxu1 %v1358_v55  ;;  %v2216_v55 = vld [vmem:[%s3594_s12] ss:$0 sm:$0xff]  ;;  %2685 = vmatpush3.bf16.msra.mxu1 %v2783_v48 }
 0x6f2   :  { %2641 = vmatmul.mubr.bf16.gmra.mrb[52].mxu1 %v1359_v53  ;;  %v1929_v53 = vsel %vm1913_vm14, 1, %v2990_v5  ;;  %2686 = vmatprep.subr.bf16.mxu1 %v2991_v49 }
 0x6f3   :  { %v2614_v57 = vpop.f32.mrb[56].mxu0  ;;  %1970 = vperm.xlu1 %2718, %v1927_v51   ;;  %1967 = vperm.xlu0 %2717, %v1926_v52   ;;  %v2785_v51 = vld [vmem:[#allocation14 + $0x10] sm:$0xff]   ;;  %v2786_v52 = vld [vmem:[#allocation14 + $0x18] sm:$0xff]  }
 0x6f4   :  { %v1325_v58 = vpop.f32.mrb[57].mxu0 }
 0x6f5   :  { %v2615_v59 = vpop.f32.mrb[58].mxu0  ;;  %2687 = vmatpush3.bf16.msra.mxu1 %v2784_v50 }
 0x6f6   :  { %v1361_v60 = vpack.c.bf16 %v2615_v59, %v2614_v57  ;;  %v1328_v61 = vpop.f32.mrb[59].mxu0  ;;  %2688 = vmatprep.subr.bf16.mxu1 %v2991_v49 }
 0x6f7   :  { %v1360_v56 = vpack.c.bf16 %v1328_v61, %v1325_v58  ;;  %1976 = vperm.xlu1 %2718, %v1929_v53   ;;  %1973 = vperm.xlu0 %2717, %v1928_v54   ;;  %v2787_v53 = vld [vmem:[#allocation14 + $0x20] sm:$0xff]   ;;  %v2788_v54 = vld [vmem:[#allocation14 + $0x28] sm:$0xff]  }
 0x6f9   :  { %2644 = vmatprep.mubr.bf16.mxu1 %v1360_v56  ;;  %2689 = vmatpush3.bf16.msra.mxu1 %v2785_v51 }
 0x6fa   :  { %2645 = vmatmul.mubr.bf16.gmra.mrb[56].mxu1 %v1361_v60  ;;  %2690 = vmatprep.subr.bf16.mxu1 %v2991_v49 }
 0x6fb   :  { %v2618_v62 = vpop.f32.mrb[60].mxu0 }
 0x6fc   :  { %v1341_v63 = vpop.f32.mrb[61].mxu0 }
 0x6fd   :  { %v2619_v1 = vpop.f32.mrb[62].mxu0  ;;  %2691 = vmatpush3.bf16.msra.mxu1 %v2786_v52 }
 0x6fe   :  { %v1363_v0 = vpack.c.bf16 %v2619_v1, %v2618_v62  ;;  %v1344_v2 = vpop.f32.mrb[63].mxu0  ;;  %2692 = vmatprep.subr.bf16.mxu1 %v2991_v49 }
 0x6ff   :  { %v1362_v3 = vpack.c.bf16 %v1344_v2, %v1341_v63 }
 0x701   :  { %2648 = vmatprep.mubr.bf16.mxu1 %v1362_v3  ;;  %2693 = vmatpush3.bf16.msra.mxu1 %v2787_v53 }
 0x702   :  { %2649 = vmatmul.mubr.bf16.gmra.mrb[60].mxu1 %v1363_v0  ;;  %2694 = vmatprep.subr.bf16.mxu1 %v2991_v49 }
 0x703   :  { %2700 = vmatprep.mubr.msk.bf16.mxu1 %vm2992_vm0, %v2991_v49 }
 0x705   :  { %2695 = vmatpush3.bf16.msra.mxu1 %v2788_v54 }
 0x706   :  { %2696 = vmatprep.subr.bf16.mxu1 %v2991_v49 }
 0x7bd   :  { %v2638_v57 = vpop.f32.mrb[48].mxu1 }
 0x7be   :  { %v1478_v58 = vadd.f32 %v2638_v57, %v2216_v55  ;;  %v1469_v59 = vpop.f32.mrb[49].mxu1  ;;  %v2790_v57 = vld [vmem:[#allocation14 + $0x38] sm:$0xff]  }
 0x7bf   :  { %v1470_v60 = vadd.f32 %v2216_v55, %v1469_v59  ;;  %v2639_v61 = vpop.f32.mrb[50].mxu1  ;;  %v3405_v59 = vpop.permute.xlu0 %1797 }
 0x7c0   :  { %v1481_v56 = vadd.f32 %v2639_v61, %v2216_v55  ;;  %v1472_v62 = vpop.f32.mrb[51].mxu1  ;;  %v1534_v1 = vmax.f32 %v1478_v58, 0.0  ;;  %v3403_v58 = vpop.permute.xlu1 %1803  ;;  %vm1844_vm2 = vcmp.eq.s32.totalorder %v3405_v59, 1 }
 0x7c1   :  { %v1473_v63 = vadd.f32 %v2216_v55, %v1472_v62  ;;  %v1532_v2 = vmax.f32 %v1470_v60, 0.0  ;;  %vm1846_vm1 = vcmp.eq.s32.totalorder %v3403_v58, 1 }
 0x7c2   :  { %v1535_v0 = vmax.f32 %v1481_v56, 0.0 }
 0x7c3   :  { %v1533_v3 = vmax.f32 %v1473_v63, 0.0  ;;  %v3409_v61 = vpop.permute.xlu0 %1800 }
 0x7c4   :  { %v1549_v14 = vpack.c.bf16 %v1535_v0, %v1534_v1  ;;  %v3407_v60 = vpop.permute.xlu1 %1806  ;;  %vm1845_vm4 = vcmp.eq.s32.totalorder %v3409_v61, 1 }
 0x7c5   :  { %v1548_v15 = vpack.c.bf16 %v1533_v3, %v1532_v2  ;;  %v2642_v18 = vpop.f32.mrb[52].mxu1  ;;  %vm1847_vm3 = vcmp.eq.s32.totalorder %v3407_v60, 1 }
 0x7c6   :  { %v1494_v19 = vadd.f32 %v2642_v18, %v2216_v55  ;;  %v1485_v5 = vpop.f32.mrb[53].mxu1 }
 0x7c7   :  { %v1486_v6 = vadd.f32 %v2216_v55, %v1485_v5  ;;  %v2643_v7 = vpop.f32.mrb[54].mxu1  ;;  %2668 = vmatprep.mubr.bf16.mxu0 %v1548_v15  ;;  %v3413_v62 = vpop.permute.xlu0 %1809 }
 0x7c8   :  { %v1497_v8 = vadd.f32 %v2643_v7, %v2216_v55  ;;  %v1488_v9 = vpop.f32.mrb[55].mxu1  ;;  %2669 = vmatmul.mubr.bf16.vlgmr.msra.gmra.mrb[64].mxu0 %v1549_v14  ;;  %v1538_v11 = vmax.f32 %v1494_v19, 0.0  ;;  %v3411_v56 = vpop.permute.xlu1 %1812  ;;  %vm1848_vm9 = vcmp.eq.s32.totalorder %v3413_v62, 1 }
 0x7c9   :  { %v1489_v10 = vadd.f32 %v2216_v55, %v1488_v9  ;;  %v1536_v13 = vmax.f32 %v1486_v6, 0.0  ;;  %vm1849_vm8 = vcmp.eq.s32.totalorder %v3411_v56, 1 }
 0x7ca   :  { %v1539_v12 = vmax.f32 %v1497_v8, 0.0 }
 0x7cb   :  { %v1537_v16 = vmax.f32 %v1489_v10, 0.0  ;;  %v3417_v1 = vpop.permute.xlu0 %1815 }
 0x7cc   :  { %v1551_v17 = vpack.c.bf16 %v1539_v12, %v1538_v11  ;;  %v3415_v63 = vpop.permute.xlu1 %1818  ;;  %v3442_v11 = vld [vmem:[%s3596_s14] ss:$0 sm:$0xff]  ;;  %vm1850_vm6 = vcmp.eq.s32.totalorder %v3417_v1, 1 }
 0x7cd   :  { %v1550_v23 = vpack.c.bf16 %v1537_v16, %v1536_v13  ;;  %v2646_v24 = vpop.f32.mrb[56].mxu1  ;;  %vm1851_vm5 = vcmp.eq.s32.totalorder %v3415_v63, 1 }
 0x7ce   :  { %v1510_v25 = vadd.f32 %v2646_v24, %v2216_v55  ;;  %v1501_v26 = vpop.f32.mrb[57].mxu1 }
 0x7cf   :  { %v1502_v27 = vadd.f32 %v2216_v55, %v1501_v26  ;;  %v2647_v28 = vpop.f32.mrb[58].mxu1  ;;  %2672 = vmatprep.mubr.bf16.mxu0 %v1550_v23  ;;  %v3421_v2 = vpop.permute.xlu0 %1931 }
 0x7d0   :  { %v1513_v29 = vadd.f32 %v2647_v28, %v2216_v55  ;;  %v1504_v30 = vpop.f32.mrb[59].mxu1  ;;  %2673 = vmatmul.mubr.bf16.gmra.mrb[68].mxu0 %v1551_v17  ;;  %v1542_v32 = vmax.f32 %v1510_v25, 0.0  ;;  %v3419_v0 = vpop.permute.xlu1 %1934  ;;  %vm1978_vm10 = vcmp.eq.s32.totalorder %v3421_v2, 1 }
 0x7d1   :  { %v1505_v31 = vadd.f32 %v2216_v55, %v1504_v30  ;;  %v1540_v34 = vmax.f32 %v1502_v27, 0.0  ;;  %vm1979_vm7 = vcmp.eq.s32.totalorder %v3419_v0, 1 }
 0x7d2   :  { %v1543_v33 = vmax.f32 %v1513_v29, 0.0 }
 0x7d3   :  { %v1541_v35 = vmax.f32 %v1505_v31, 0.0  ;;  %v1938_v14 = vpop.permute.xlu0 %1937 }
 0x7d4   :  { %v1553_v36 = vpack.c.bf16 %v1543_v33, %v1542_v32  ;;  %v1941_v3 = vpop.permute.xlu1 %1940  ;;  %vm1980_vm12 = vcmp.eq.s32.totalorder %v1938_v14, 1 }
 0x7d5   :  { %v1552_v37 = vpack.c.bf16 %v1541_v35, %v1540_v34  ;;  %v2650_v38 = vpop.f32.mrb[60].mxu1  ;;  %vm1981_vm11 = vcmp.eq.s32.totalorder %v1941_v3, 1 }
 0x7d6   :  { %v1526_v39 = vadd.f32 %v2650_v38, %v2216_v55  ;;  %v1517_v40 = vpop.f32.mrb[61].mxu1 }
 0x7d7   :  { %v1518_v41 = vadd.f32 %v2216_v55, %v1517_v40  ;;  %v2651_v42 = vpop.f32.mrb[62].mxu1  ;;  %2676 = vmatprep.mubr.bf16.mxu0 %v1552_v37  ;;  %v3425_v18 = vpop.permute.xlu0 %1943 }
 0x7d8   :  { %v1529_v43 = vadd.f32 %v2651_v42, %v2216_v55  ;;  %v1520_v44 = vpop.f32.mrb[63].mxu1  ;;  %2677 = vmatmul.mubr.bf16.gmra.mrb[72].mxu0 %v1553_v36  ;;  %v1546_v46 = vmax.f32 %v1526_v39, 0.0  ;;  %v3423_v15 = vpop.permute.xlu1 %1946  ;;  %vm1982_vm14 = vcmp.eq.s32.totalorder %v3425_v18, 1 }
 0x7d9   :  { %v1521_v45 = vadd.f32 %v2216_v55, %v1520_v44  ;;  %v1544_v21 = vmax.f32 %v1518_v41, 0.0  ;;  %v2789_v55 = vld [vmem:[#allocation14 + $0x30] sm:$0xff]   ;;  %vm1983_vm13 = vcmp.eq.s32.totalorder %v3423_v15, 1 }
 0x7da   :  { %v1547_v20 = vmax.f32 %v1529_v43, 0.0  ;;  %2697 = vmatpush3.bf16.msra.mxu1 %v2789_v55 }
 0x7db   :  { %v1545_v22 = vmax.f32 %v1521_v45, 0.0  ;;  %2698 = vmatprep.subr.bf16.mxu1 %v2991_v49  ;;  %v3429_v5 = vpop.permute.xlu0 %1949 }
 0x7dc   :  { %v1555_v47 = vpack.c.bf16 %v1547_v20, %v1546_v46  ;;  %v3427_v19 = vpop.permute.xlu1 %1952  ;;  %vm1984_vm0 = vcmp.eq.s32.totalorder %v3429_v5, 1 }
 0x7dd   :  { %v1554_v4 = vpack.c.bf16 %v1545_v22, %v1544_v21  ;;  %vm1985_vm15 = vcmp.eq.s32.totalorder %v3427_v19, 1 }
 0x7de   :  { %2699 = vmatpush3.bf16.msra.mxu1 %v2790_v57 }
 0x7df   :  { %2680 = vmatprep.mubr.bf16.mxu0 %v1554_v4  ;;  %v3433_v7 = vpop.permute.xlu0 %1821 }
 0x7e0   :  { %2681 = vmatmul.mubr.bf16.gmra.mrb[76].mxu0 %v1555_v47  ;;  %v3431_v6 = vpop.permute.xlu1 %1824 }
 0x7e3   :  { %v3437_v9 = vpop.permute.xlu0 %1827 }
 0x7e4   :  { %v3435_v8 = vpop.permute.xlu1 %1830 }
 0x7e7   :  { %v3446_v17 = vpop.permute.xlu0 %1955 }
 0x7e8   :  { %v3444_v13 = vpop.permute.xlu1 %1958 }
 0x7eb   :  { %v3461_v32 = vpop.permute.xlu0 %1961 }
 0x7ec   :  { %v3456_v30 = vpop.permute.xlu1 %1964 }
 0x7ef   :  { %v3490_v4 = vpop.permute.xlu0 %1833 }
 0x7f0   :  { %v3478_v46 = vpop.permute.xlu1 %1836 }
 0x89b   :  { %v2670_v10 = vpop.f32.mrb[64].mxu0 }
 0x89c   :  { %v1661_v12 = vpop.f32.mrb[65].mxu0  ;;  %v1670_v23 = vadd.f32 %v2670_v10, %v3442_v11 }
 0x89d   :  { %v2671_v16 = vpop.f32.mrb[66].mxu0  ;;  %v1662_v26 = vadd.f32 %v3442_v11, %v1661_v12 }
 0x89e   :  { %v1673_v24 = vadd.f32 %v2671_v16, %v3442_v11  ;;  %v1664_v25 = vpop.f32.mrb[67].mxu0 }
 0x89f   :  { %v1665_v27 = vadd.f32 %v3442_v11, %v1664_v25 }
 0x8a0   :  { %v1725_v28 = vpack.c.bf16 %v1673_v24, %v1670_v23  ;;  %v3528_v23 = vpop.permute.xlu1 %1842 }
 0x8a1   :  { %v1724_v29 = vpack.c.bf16 %v1665_v27, %v1662_v26  ;;  %v1840_v27 = vpop.permute.xlu0 %1839 }
 0x8a2   :  { %v1734_v33 = vunpack.c.l.bf16 %v1725_v28  ;;  %v1735_v35 = vunpack.c.h.bf16 %v1725_v28 }
 0x8a3   :  { %v2674_v31 = vpop.f32.mrb[68].mxu0  ;;  %v1732_v37 = vunpack.c.l.bf16 %v1724_v29  ;;  %v1733_v38 = vunpack.c.h.bf16 %v1724_v29 }
 0x8a4   :  { %v1677_v34 = vpop.f32.mrb[69].mxu0  ;;  %v1686_v39 = vadd.f32 %v2674_v31, %v3442_v11  ;;  %v3476_v44 = vsel %vm1846_vm1, %v1734_v33, -inf  ;;  %v3482_v20 = vsel %vm1847_vm3, %v1735_v35, -inf  ;;  %v3485_v21 = vsel %vm1980_vm12, %v1734_v33, -inf }
 0x8a5   :  { %v2675_v36 = vpop.f32.mrb[70].mxu0  ;;  %v1678_v42 = vadd.f32 %v3442_v11, %v1677_v34  ;;  %v3488_v22 = vsel %vm1981_vm11, %v1735_v35, -inf  ;;  %v3494_v48 = vsel %vm1844_vm2, %v1732_v37, -inf  ;;  %v3498_v49 = vsel %vm1845_vm4, %v1733_v38, -inf }
 0x8a6   :  { %v1689_v40 = vadd.f32 %v2675_v36, %v3442_v11  ;;  %v1680_v41 = vpop.f32.mrb[71].mxu0  ;;  %v3502_v52 = vsel %vm1978_vm10, %v1732_v37, -inf  ;;  %v3506_v53 = vsel %vm1979_vm7, %v1733_v38, -inf  ;;  %vm1853_vm1 = vcmp.eq.s32.totalorder %v3431_v6, 1 }
 0x8a7   :  { %v1681_v43 = vadd.f32 %v3442_v11, %v1680_v41  ;;  %vm1852_vm2 = vcmp.eq.s32.totalorder %v3433_v7, 1  ;;  %vm1855_vm3 = vcmp.eq.s32.totalorder %v3435_v8, 1  ;;  %vm1854_vm4 = vcmp.eq.s32.totalorder %v3437_v9, 1  ;;  %v1968_v41 = vpop.permute.xlu0 %1967 }
 0x8a8   :  { %v1727_v45 = vpack.c.bf16 %v1689_v40, %v1686_v39  ;;  %vm1989_vm7 = vcmp.eq.s32.totalorder %v3456_v30, 1  ;;  %v1971_v39 = vpop.permute.xlu1 %1970  ;;  %vm1856_vm10 = vcmp.eq.s32.totalorder %v3490_v4, 1  ;;  %vm1859_vm11 = vcmp.eq.s32.totalorder %v3528_v23, 1 }
 0x8a9   :  { %v1726_v47 = vpack.c.bf16 %v1681_v43, %v1678_v42  ;;  %vm1858_vm12 = vcmp.eq.s32.totalorder %v1840_v27, 1 }
 0x8aa   :  { %v1738_v50 = vunpack.c.l.bf16 %v1727_v45  ;;  %v1739_v51 = vunpack.c.h.bf16 %v1727_v45 }
 0x8ab   :  { %v1736_v54 = vunpack.c.l.bf16 %v1726_v47  ;;  %v1737_v55 = vunpack.c.h.bf16 %v1726_v47  ;;  %v2678_v57 = vpop.f32.mrb[72].mxu0 }
 0x8ac   :  { %v1866_v58 = vsel %vm1850_vm6, %v1738_v50, -inf  ;;  %v1867_v59 = vsel %vm1851_vm5, %v1739_v51, -inf  ;;  %v2000_v60 = vsel %vm1984_vm0, %v1738_v50, -inf  ;;  %v2001_v61 = vsel %vm1985_vm15, %v1739_v51, -inf  ;;  %v1693_v2 = vpop.f32.mrb[73].mxu0  ;;  %v1977_v6 = vpop.permute.xlu1 %1976 }
 0x8ad   :  { %v1878_v0 = vmax.f32 %v3476_v44, %v1866_v58  ;;  %v1879_v3 = vmax.f32 %v3482_v20, %v1867_v59  ;;  %v2012_v14 = vmax.f32 %v3485_v21, %v2000_v60  ;;  %v2013_v10 = vmax.f32 %v3488_v22, %v2001_v61  ;;  %v2679_v1 = vpop.f32.mrb[74].mxu0 }
 0x8ae   :  { %v1864_v63 = vsel %vm1848_vm9, %v1736_v54, -inf  ;;  %v1865_v5 = vsel %vm1849_vm8, %v1737_v55, -inf  ;;  %v1998_v19 = vsel %vm1982_vm14, %v1736_v54, -inf  ;;  %v1999_v12 = vsel %vm1983_vm13, %v1737_v55, -inf  ;;  %v1696_v16 = vpop.f32.mrb[75].mxu0 }
 0x8af   :  { %v1876_v24 = vmax.f32 %v3494_v48, %v1864_v63  ;;  %v1877_v25 = vmax.f32 %v3498_v49, %v1865_v5  ;;  %v2010_v26 = vmax.f32 %v3502_v52, %v1998_v19  ;;  %v2011_v62 = vmax.f32 %v3506_v53, %v1999_v12 }
 0x8b0   :  { %v1702_v56 = vadd.f32 %v2678_v57, %v3442_v11  ;;  %v1694_v18 = vadd.f32 %v3442_v11, %v1693_v2  ;;  %v1705_v28 = vadd.f32 %v2679_v1, %v3442_v11  ;;  %v1697_v15 = vadd.f32 %v3442_v11, %v1696_v16  ;;  %v1974_v57 = vpop.permute.xlu0 %1973 }
 0x8b1   :  { %vm1987_vm5 = vcmp.eq.s32.totalorder %v3444_v13, 1  ;;  %vm1986_vm6 = vcmp.eq.s32.totalorder %v3446_v17, 1  ;;  %vm1988_vm8 = vcmp.eq.s32.totalorder %v3461_v32, 1  ;;  %vm1857_vm9 = vcmp.eq.s32.totalorder %v3478_v46, 1 }
 0x8b2   :  { %v1729_v29 = vpack.c.bf16 %v1705_v28, %v1702_v56  ;;  %v1728_v31 = vpack.c.bf16 %v1697_v15, %v1694_v18  ;;  %vm1991_vm13 = vcmp.eq.s32.totalorder %v1971_v39, 1  ;;  %vm1990_vm14 = vcmp.eq.s32.totalorder %v1968_v41, 1 }
 0x8b3   :  { %v2682_v33 = vpop.f32.mrb[76].mxu0  ;;  %vm1993_vm15 = vcmp.eq.s32.totalorder %v1977_v6, 1  ;;  %vm1992_vm0 = vcmp.eq.s32.totalorder %v1974_v57, 1 }
 0x8b4   :  { %v1742_v34 = vunpack.c.l.bf16 %v1729_v29  ;;  %v1743_v35 = vunpack.c.h.bf16 %v1729_v29  ;;  %v1740_v36 = vunpack.c.l.bf16 %v1728_v31  ;;  %v1741_v37 = vunpack.c.h.bf16 %v1728_v31  ;;  %v1709_v38 = vpop.f32.mrb[77].mxu0 }
 0x8b5   :  { %v2683_v40 = vpop.f32.mrb[78].mxu0  ;;  %v1718_v53 = vadd.f32 %v2682_v33, %v3442_v11  ;;  %v1710_v54 = vadd.f32 %v3442_v11, %v1709_v38 }
 0x8b6   :  { %v1870_v42 = vsel %vm1854_vm4, %v1742_v34, -inf  ;;  %v1871_v9 = vsel %vm1855_vm3, %v1743_v35, -inf  ;;  %v2004_v43 = vsel %vm1988_vm8, %v1742_v34, -inf  ;;  %v2005_v44 = vsel %vm1989_vm7, %v1743_v35, -inf  ;;  %v1712_v45 = vpop.f32.mrb[79].mxu0 }
 0x8b7   :  { %v1882_v20 = vmax.f32 %v1878_v0, %v1870_v42  ;;  %v1883_v21 = vmax.f32 %v1879_v3, %v1871_v9  ;;  %v2016_v22 = vmax.f32 %v2012_v14, %v2004_v43  ;;  %v2017_v47 = vmax.f32 %v2013_v10, %v2005_v44  ;;  %v2234_v9 = vld [vmem:[%s3598_s16] ss:$0 sm:$0xff] }
 0x8b8   :  { %v1868_v48 = vsel %vm1852_vm2, %v1740_v36, -inf  ;;  %v1869_v30 = vsel %vm1853_vm1, %v1741_v37, -inf  ;;  %v2002_v32 = vsel %vm1986_vm6, %v1740_v36, -inf  ;;  %v2003_v8 = vsel %vm1987_vm5, %v1741_v37, -inf }
 0x8b9   :  { %v1880_v49 = vmax.f32 %v1876_v24, %v1868_v48  ;;  %v1881_v50 = vmax.f32 %v1877_v25, %v1869_v30  ;;  %v2014_v51 = vmax.f32 %v2010_v26, %v2002_v32  ;;  %v2015_v52 = vmax.f32 %v2011_v62, %v2003_v8 }
 0x8ba   :  { %v1721_v7 = vadd.f32 %v2683_v40, %v3442_v11  ;;  %v1713_v55 = vadd.f32 %v3442_v11, %v1712_v45 }
 0x8bc   :  { %v1731_v58 = vpack.c.bf16 %v1721_v7, %v1718_v53  ;;  %v1730_v17 = vpack.c.bf16 %v1713_v55, %v1710_v54 }
 0x8be   :  { %v1746_v13 = vunpack.c.l.bf16 %v1731_v58  ;;  %v1747_v59 = vunpack.c.h.bf16 %v1731_v58  ;;  %v1744_v60 = vunpack.c.l.bf16 %v1730_v17  ;;  %v1745_v61 = vunpack.c.h.bf16 %v1730_v17 }
 0x8c0   :  { %v1874_v11 = vsel %vm1858_vm12, %v1746_v13, -inf  ;;  %v1875_v2 = vsel %vm1859_vm11, %v1747_v59, -inf  ;;  %v2008_v0 = vsel %vm1992_vm0, %v1746_v13, -inf  ;;  %v2009_v3 = vsel %vm1993_vm15, %v1747_v59, -inf }
 0x8c1   :  { %v1886_v14 = vmax.f32 %v1882_v20, %v1874_v11  ;;  %v1887_v10 = vmax.f32 %v1883_v21, %v1875_v2  ;;  %v2020_v1 = vmax.f32 %v2016_v22, %v2008_v0  ;;  %v2021_v63 = vmax.f32 %v2017_v47, %v2009_v3 }
 0x8c2   :  { %v1872_v5 = vsel %vm1856_vm10, %v1744_v60, -inf  ;;  %v1873_v19 = vsel %vm1857_vm9, %v1745_v61, -inf  ;;  %v2006_v12 = vsel %vm1990_vm14, %v1744_v60, -inf  ;;  %v2007_v16 = vsel %vm1991_vm13, %v1745_v61, -inf }
 0x8c3   :  { %v1889_v23 = vmax.f32 %v1886_v14, %v1887_v10  ;;  %v2023_v24 = vmax.f32 %v2020_v1, %v2021_v63  ;;  %v1884_v25 = vmax.f32 %v1880_v49, %v1872_v5  ;;  %v1885_v26 = vmax.f32 %v1881_v50, %v1873_v19 }
 0x8c4   :  { %v2018_v62 = vmax.f32 %v2014_v51, %v2006_v12  ;;  %v2019_v27 = vmax.f32 %v2015_v52, %v2007_v16 }
 0x8c5   :  { %v1888_v56 = vmax.f32 %v1884_v25, %v1885_v26 }
 0x8c6   :  { %v2022_v18 = vmax.f32 %v2018_v62, %v2019_v27 }
 0x8c7   :  { %v1890_v28 = vmax.f32 %v1888_v56, %v1889_v23 }
 0x8c8   :  { %v2024_v15 = vmax.f32 %v2022_v18, %v2023_v24 }
 0x8c9   :  { %v1891_v29 = vrot.slane %v1890_v28, 4 }
 0x8ca   :  { %v2025_v31 = vrot.slane %v2024_v15, 4 }
 0x8cb   :  { %v1892_v33 = vmax.f32 %v1890_v28, %v1891_v29 }
 0x8cc   :  { %v2026_v4 = vmax.f32 %v2024_v15, %v2025_v31 }
 0x8cd   :  { %v1893_v34 = vrot.slane %v1892_v33, 2 }
 0x8ce   :  { %v2027_v35 = vrot.slane %v2026_v4, 2 }
 0x8cf   :  { %v1894_v46 = vmax.f32 %v1892_v33, %v1893_v34 }
 0x8d0   :  { %v2028_v36 = vmax.f32 %v2026_v4, %v2027_v35 }
 0x8d1   :  { %v1895_v37 = vrot.slane %v1894_v46, 1 }
 0x8d2   :  { %v2029_v38 = vrot.slane %v2028_v36, 1 }
 0x8d3   :  { %v1896_v39 = vmax.f32 %v1894_v46, %v1895_v37 }
 0x8d4   :  { %v2030_v40 = vmax.f32 %v2028_v36, %v2029_v38 }
 0x8d5   :  { %1897 = vst [vmem:[#allocation2] sm:$0x1] %v1896_v39 }
 0x8d6   :  { %2031 = vst [vmem:[#allocation2 + $0x1] sm:$0x1] %v2030_v40 }
 0x8dd   :  { %v2032_v41 = vld [vmem:[#allocation2] sm:$0x3] }
 0x8de   :  { %v2033_v42 = vpack.c.bf16 %v2032_v41, %v2032_v41 }
 0x8e0   :  { %2701 = vmatmul.mubr.bf16.vlgmr.msra.gmra.mrb[64].mxu1 %v2033_v42 }
 0x9b3   :  { %v2139_v43 = vpop.f32.mrb[64].mxu1 }
 0x9b4   :  { %v2140_v44 = vadd.f32 %v2234_v9, %v2139_v43  ;;  %v2702_v45 = vpop.f32.mrb[65].mxu1 }
 0x9b5   :  { %v2142_v20 = vpop.f32.mrb[66].mxu1 }
 0x9b6   :  { %2145 = vst [vmem:[#allocation15] sm:$0x3] %v2140_v44  ;;  %v2703_v21 = vpop.f32.mrb[67].mxu1 }
 0x9b7   :  { %2960 = shalt.err (!%p2957_p4)
}
 0x9b8   :  { %s2961_s16 = scalar_lea.hbm %s3599_s17, 32 }
 0x9b9   :  { %p2962_p5 = scmp.ne.s32.totalorder %s3599_s17, %s2961_s16  ;;  %p2965_p6 = scmp.lt.u32.totalorder %s2961_s16, %s3599_s17 }
 0x9bb   :  { %p2967_p7 = pnand %p2965_p6, %p2962_p5 }
 0x9bd   :  { %2970 = shalt.err (!%p2967_p7)
}
 0x9be   :  { %2155 = dma.vmem_to_hbm [thread:$0]  %s2153_s0, 32, %s3599_s17, [#allocation5]  }
 0x9bf   :  { %2979 = dma.done.wait [#allocation5], 32  }
 0x9c0   :  { %2980 = vsyncadd [#allocation5], 4294967264 }
 0x9c1   :  { %2159 = vsyncpa [#allocation4], 1 }
 0x9c2   :  { %2160 = vsyncpa [#allocation7], 1 }
 0x9c3   :  { %2161 = vsyncpa [#allocation10], 1 }
 0x9c4   :  { %2162 = vsyncpa [#allocation13], 1 }
 0x9c5   :  { %2163 = vsyncpa [#allocation5], 1 }

</bundles_post_ra>
